<compile_context>
chip_gen: v6e
topology: v6e:2x2x1
jax: 0.10.0
libtpu: 0.0.40
codegen_flags: <defaults>
</compile_context>

<pallas_src>
import math

import numpy as np

import jax
import jax.numpy as jnp
from jax.experimental import pallas as pl
from jax.experimental.pallas import tpu as pltpu  # noqa: F401  (grid-less kernel; no TPU-specific params needed)

# ---------------- small config consistent with the module ----------------
B = 2
FEATURE_DIM = 32
CHANNELS = 4
IMAGE_SIZE = 16
PATCH_SIZE = 4
DIM = 32
NUM_LAYERS = 2
NUM_PATCH = (IMAGE_SIZE // PATCH_SIZE) ** 2          # 16
OUT_CH = CHANNELS * PATCH_SIZE * PATCH_SIZE          # 64
BD = B * DIM                                         # 64 (activation lane width)
LN_EPS = 1e-5
LANES = 128

assert DIM == 2 * NUM_PATCH                           # head packing relies on this
assert 2 * BD <= LANES and B * OUT_CH <= LANES


def _gelu_exact(x):
    # PyTorch nn.GELU() default (erf form)
    return 0.5 * x * (1.0 + jax.lax.erf(x * (1.0 / math.sqrt(2.0))))


# ----------------------- constant-slab layout (static) ----------------------
def _build_slab_layout():
    offs = {}
    rows = 0

    def alloc(name, n):
        nonlocal rows
        offs[name] = rows
        rows += (n + 7) & ~7                          # keep every block 8-row aligned

    alloc("head_w", 2 * NUM_PATCH)                    # (32, FEATURE_DIM)
    alloc("head_add", 2 * NUM_PATCH)                  # (32, B*DIM)   bias + pos_emb
    alloc("avg_tok", NUM_PATCH)                       # (16, 16)      patch-axis averaging
    alloc("avg_ch", 2 * BD)                           # (128, 128)    per-32-lane-block averaging
    for l in range(NUM_LAYERS):
        alloc(f"mix_w1_{l}", NUM_PATCH)               # (16, 16)  (transposed, LN-gamma folded)
        alloc(f"mix_w2_{l}", NUM_PATCH)               # (16, 16)  (transposed)
        alloc(f"mix_b1_{l}", NUM_PATCH)               # (16, 1)
        alloc(f"mix_b2_{l}", NUM_PATCH)               # (16, 1)
        alloc(f"mlp_w1_{l}", BD)                      # (64, 64)  block-diag over batch
        alloc(f"mlp_w2_{l}", BD)                      # (64, 64)
        alloc(f"mlp_b1_{l}", 1)                       # (1, 64)
        alloc(f"mlp_b2_{l}", 1)                       # (1, 64)
    alloc("tc_w", BD)                                 # (64, 128) block-diag over batch
    alloc("tc_b", 1)                                  # (1, 128)
    return offs, rows


SLAB_OFFS, SLAB_ROWS = _build_slab_layout()


# ------------------------------ Pallas kernel ------------------------------
def remixer_fused_kernel(xb_ref, slab_ref, o_ref):
    """Whole ReMixerImageGenerator forward, one grid-less step, batch-in-lanes.

    xb_ref  : (FEATURE_DIM, B*DIM)   input features broadcast over the DIM
                                     lanes of each batch block: xb[k, b*DIM+j] = x[b, k]
    slab_ref: (SLAB_ROWS, 128)       all constants, packed per _build_slab_layout
    o_ref   : (NUM_PATCH, B*OUT_CH)  lane-dense output (batch-major lane blocks)

    Activation layout: act[i, b*DIM + d] == x[b, patch=i, feature=d].
    """
    f32 = jnp.float32
    hi = jax.lax.Precision.HIGHEST

    def cblock(name, rows, cols):
        r = SLAB_OFFS[name]
        return slab_ref[r:r + rows, 0:cols]

    # ---- feature2patch + pos_emb + repeat_interleave(2)/chunk(2) split ------
    # Both halves of the split come out of one (32,32)@(32,64) matmul; the
    # head addend already contains feature2patch bias + gathered pos_emb.
    w_head = cblock("head_w", 2 * NUM_PATCH, FEATURE_DIM)          # (32, 32)
    a_head = cblock("head_add", 2 * NUM_PATCH, BD)                 # (32, 64)
    z0 = jnp.dot(w_head, xb_ref[...], preferred_element_type=f32) + a_head
    x1 = z0[:NUM_PATCH, :]                                         # (16, 64)
    x2 = z0[NUM_PATCH:, :]                                         # (16, 64)

    avg_tok = cblock("avg_tok", NUM_PATCH, NUM_PATCH)              # (16, 16) of 1/16
    avg_ch = cblock("avg_ch", 2 * BD, 2 * BD)                      # (128, 128)

    for l in range(NUM_LAYERS):                                    # static unroll
        # ---- F = MixerMLP over the patch axis (rows), applied to x2 ----------
        # One-pass LN stats: one matmul against [x2 | x2^2], var = E[x^2]-mu^2.
        st = jnp.dot(avg_tok, jnp.concatenate([x2, x2 * x2], axis=1),
                     preferred_element_type=f32, precision=hi)     # (16, 128)
        mu = st[:, :BD]
        var = st[:, BD:] - mu * mu
        xn = (x2 - mu) * jax.lax.rsqrt(var + LN_EPS)
        h = _gelu_exact(
            jnp.dot(cblock(f"mix_w1_{l}", NUM_PATCH, NUM_PATCH), xn,
                    preferred_element_type=f32)
            + cblock(f"mix_b1_{l}", NUM_PATCH, 1))
        f_out = (jnp.dot(cblock(f"mix_w2_{l}", NUM_PATCH, NUM_PATCH), h,
                         preferred_element_type=f32)
                 + cblock(f"mix_b2_{l}", NUM_PATCH, 1))
        y1 = x1 + f_out

        # ---- G = ElementWiseMLP over the feature axis (32-lane blocks), on y1.
        st2 = jnp.dot(jnp.concatenate([y1, y1 * y1], axis=1), avg_ch,
                      preferred_element_type=f32, precision=hi)    # (16, 128)
        mu2 = st2[:, :BD]
        var2 = st2[:, BD:] - mu2 * mu2
        un = (y1 - mu2) * jax.lax.rsqrt(var2 + LN_EPS)
        h2 = _gelu_exact(
            jnp.dot(un, cblock(f"mlp_w1_{l}", BD, BD),
                    preferred_element_type=f32)
            + cblock(f"mlp_b1_{l}", 1, BD))
        g_out = (jnp.dot(h2, cblock(f"mlp_w2_{l}", BD, BD),
                         preferred_element_type=f32)
                 + cblock(f"mlp_b2_{l}", 1, BD))
        y2 = x2 + g_out

        x1, x2 = y1, y2

    # ---- (x1 + x2)/2 -> to_channels via block-diagonal weight, lane-dense ----
    z = (x1 + x2) * 0.5                                            # (16, 64)
    y = (jnp.dot(z, cblock("tc_w", BD, B * OUT_CH), preferred_element_type=f32)
         + cblock("tc_b", 1, B * OUT_CH))                          # (16, 128)
    o_ref[...] = y                                                 # one unmasked 128-lane store


def _cost_estimate():
    flops = 2 * (
        (2 * NUM_PATCH) * FEATURE_DIM * BD                         # head
        + NUM_LAYERS * (
            NUM_PATCH * NUM_PATCH * (2 * BD)                       # token LN stats
            + 2 * NUM_PATCH * NUM_PATCH * BD                       # token fc1 + fc2
            + NUM_PATCH * (2 * BD) * (2 * BD)                      # channel LN stats
            + 2 * NUM_PATCH * BD * BD)                             # channel fc1 + fc2
        + NUM_PATCH * BD * (B * OUT_CH))                           # to_channels
    transcendentals = NUM_LAYERS * 4 * NUM_PATCH * BD              # 2x erf + 2x rsqrt per layer
    bytes_accessed = 4 * (SLAB_ROWS * LANES + FEATURE_DIM * BD + NUM_PATCH * B * OUT_CH)
    return pl.CostEstimate(flops=flops, transcendentals=transcendentals,
                           bytes_accessed=bytes_accessed)


# ------------------------------- wrappers ----------------------------------
def patch2image(y):
    # F.fold with kernel_size == stride == patch_size -> pure rearrangement.
    hp = IMAGE_SIZE // PATCH_SIZE
    wp = IMAGE_SIZE // PATCH_SIZE
    y = y.reshape(B, hp, wp, CHANNELS, PATCH_SIZE, PATCH_SIZE)
    y = y.transpose(0, 3, 1, 4, 2, 5)
    return y.reshape(B, CHANNELS, IMAGE_SIZE, IMAGE_SIZE)


def forward(x, slab):
    # Broadcast the (B, FEATURE_DIM) input across the DIM lanes of each batch
    # block so the fused head matmul directly produces lane-dense activations.
    x_bc = jnp.repeat(jnp.transpose(x), DIM, axis=1)               # (FD, B*DIM)
    o = pl.pallas_call(
        remixer_fused_kernel,
        out_shape=jax.ShapeDtypeStruct((NUM_PATCH, B * OUT_CH), jnp.float32),
        cost_estimate=_cost_estimate(),
    )(x_bc, slab)
    # (NUM_PATCH, B*OUT_CH) -> (B, NUM_PATCH, OUT_CH) -> NCHW image
    y = o.reshape(NUM_PATCH, B, OUT_CH).transpose(1, 0, 2)
    return patch2image(y)


# ------------------ deterministic parameters + packing ---------------------
def _linear_init(key, fan_in, fan_out):
    kw, kb = jax.random.split(key)
    bound = 1.0 / math.sqrt(fan_in)
    w = jax.random.uniform(kw, (fan_in, fan_out), jnp.float32, -bound, bound)
    b = jax.random.uniform(kb, (fan_out,), jnp.float32, -bound, bound)
    return w, b


def init_params(key):
    """Module-style parameters (weights stored as [in, out], y = x @ W + b)."""
    keys = jax.random.split(key, 3 + 4 * NUM_LAYERS)
    params = {}
    params["pos_emb"] = jax.random.normal(keys[0], (NUM_PATCH, DIM), jnp.float32)
    params["f2p_w"], params["f2p_b"] = _linear_init(keys[1], FEATURE_DIM, DIM)
    params["tc_w"], params["tc_b"] = _linear_init(keys[2], DIM, OUT_CH)

    mw1, mb1, mw2, mb2, ew1, eb1, ew2, eb2 = ([] for _ in range(8))
    for l in range(NUM_LAYERS):
        k0, k1, k2, k3 = keys[3 + 4 * l: 3 + 4 * l + 4]
        w, b = _linear_init(k0, NUM_PATCH, NUM_PATCH); mw1.append(w); mb1.append(b)
        w, b = _linear_init(k1, NUM_PATCH, NUM_PATCH); mw2.append(w); mb2.append(b)
        w, b = _linear_init(k2, DIM, DIM); ew1.append(w); eb1.append(b)
        w, b = _linear_init(k3, DIM, DIM); ew2.append(w); eb2.append(b)

    params["mix_w1"] = jnp.stack(mw1); params["mix_b1"] = jnp.stack(mb1)
    params["mix_w2"] = jnp.stack(mw2); params["mix_b2"] = jnp.stack(mb2)
    params["mlp_w1"] = jnp.stack(ew1); params["mlp_b1"] = jnp.stack(eb1)
    params["mlp_w2"] = jnp.stack(ew2); params["mlp_b2"] = jnp.stack(eb2)

    # LayerNorm affine params (PyTorch default: gamma=1, beta=0)
    params["mix_ln_g"] = jnp.ones((NUM_LAYERS, NUM_PATCH), jnp.float32)
    params["mix_ln_b"] = jnp.zeros((NUM_LAYERS, NUM_PATCH), jnp.float32)
    params["mlp_ln_g"] = jnp.ones((NUM_LAYERS, DIM), jnp.float32)
    params["mlp_ln_b"] = jnp.zeros((NUM_LAYERS, DIM), jnp.float32)
    return params


def pack_params(p):
    """One-time repack of the module parameters into a single (R, 128) slab.

    Exact algebraic refactorings of the PyTorch forward:
      * feature2patch + repeat_interleave(num_patch) + repeat_interleave(2) +
        chunk(2) -> column gather of f2p_w / f2p_b / pos_emb,
      * token-mix weights transposed so the kernel contracts over the patch
        (row) axis with a plain W @ X matmul,
      * channel-mix / to_channels weights made block-diagonal over the batch
        (batch lives in the lane axis),
      * LayerNorm gamma/beta folded into the following fc1 weight/bias,
      * LN statistics come from constant averaging matrices (MXU does the
        reduce AND the broadcast back across lanes).
    """
    P = {k: np.asarray(v, np.float32) for k, v in p.items()}
    slab = np.zeros((SLAB_ROWS, LANES), np.float32)

    def put(name, arr):
        arr = np.asarray(arr, np.float32)
        if arr.ndim == 1:
            arr = arr[None, :]
        r = SLAB_OFFS[name]
        slab[r:r + arr.shape[0], 0:arr.shape[1]] = arr

    # ---- head: both repeat_interleave halves, weight + (bias + pos_emb) ----
    f2p_w, f2p_b, pos = P["f2p_w"], P["f2p_b"], P["pos_emb"]
    put("head_w", np.concatenate([f2p_w[:, 0::2].T, f2p_w[:, 1::2].T], axis=0))
    j = np.arange(DIM)
    a1 = f2p_b[0::2][:, None] + pos[:, j // 2]                     # (NP, DIM)
    a2 = f2p_b[1::2][:, None] + pos[:, DIM // 2 + j // 2]          # (NP, DIM)
    put("head_add", np.concatenate([np.tile(a1, (1, B)), np.tile(a2, (1, B))], axis=0))

    # ---- LayerNorm averaging matrices --------------------------------------
    put("avg_tok", np.full((NUM_PATCH, NUM_PATCH), 1.0 / NUM_PATCH, np.float32))
    mavg = np.kron(np.eye(B, dtype=np.float32),
                   np.full((DIM, DIM), 1.0 / DIM, np.float32))     # (64, 64)
    avg_ch = np.zeros((2 * BD, 2 * BD), np.float32)
    avg_ch[:BD, :BD] = mavg                                        # -> per-block mean
    avg_ch[BD:, BD:] = mavg                                        # -> per-block E[x^2]
    put("avg_ch", avg_ch)

    eye_b = np.eye(B, dtype=np.float32)
    for l in range(NUM_LAYERS):
        # token-mixing MLP (over the patch axis); fold LN affine into fc1
        g, beta = P["mix_ln_g"][l], P["mix_ln_b"][l]
        w1 = P["mix_w1"][l] * g[:, None]
        b1 = P["mix_b1"][l] + beta @ P["mix_w1"][l]
        put(f"mix_w1_{l}", w1.T)
        put(f"mix_w2_{l}", P["mix_w2"][l].T)
        put(f"mix_b1_{l}", b1[:, None])
        put(f"mix_b2_{l}", P["mix_b2"][l][:, None])

        # channel-mixing MLP (over the feature lanes); fold LN affine into fc1
        g, beta = P["mlp_ln_g"][l], P["mlp_ln_b"][l]
        w1 = g[:, None] * P["mlp_w1"][l]
        b1 = P["mlp_b1"][l] + beta @ P["mlp_w1"][l]
        put(f"mlp_w1_{l}", np.kron(eye_b, w1))
        put(f"mlp_w2_{l}", np.kron(eye_b, P["mlp_w2"][l]))
        put(f"mlp_b1_{l}", np.tile(b1, B))
        put(f"mlp_b2_{l}", np.tile(P["mlp_b2"][l], B))

    # ---- to_channels: block-diagonal over batch -> lane-dense (16,128) out --
    put("tc_w", np.kron(eye_b, P["tc_w"]))
    put("tc_b", np.tile(P["tc_b"], B))
    return jnp.asarray(slab)


# ------------------------- pure-JAX reference (self-check) ------------------
def reference_forward(x, p):
    def ln(v, g, b):
        mu = jnp.mean(v, axis=-1, keepdims=True)
        var = jnp.mean((v - mu) ** 2, axis=-1, keepdims=True)
        return (v - mu) * jax.lax.rsqrt(var + LN_EPS) * g + b

    h = x @ p["f2p_w"] + p["f2p_b"]                                # (B, DIM)
    z = jnp.repeat(h, NUM_PATCH, axis=1).reshape(B, NUM_PATCH, DIM)
    z = z + p["pos_emb"][None]
    zz = jnp.repeat(z, 2, axis=2)
    x1, x2 = zz[..., :DIM], zz[..., DIM:]
    for l in range(NUM_LAYERS):
        u = jnp.swapaxes(x2, 1, 2)                                 # (B, DIM, NP)
        u = ln(u, p["mix_ln_g"][l], p["mix_ln_b"][l])
        u = _gelu_exact(u @ p["mix_w1"][l] + p["mix_b1"][l])
        u = u @ p["mix_w2"][l] + p["mix_b2"][l]
        y1 = x1 + jnp.swapaxes(u, 1, 2)
        v = ln(y1, p["mlp_ln_g"][l], p["mlp_ln_b"][l])
        v = _gelu_exact(v @ p["mlp_w1"][l] + p["mlp_b1"][l])
        y2 = x2 + (v @ p["mlp_w2"][l] + p["mlp_b2"][l])
        x1, x2 = y1, y2
    zo = (x1 + x2) * 0.5
    y = zo @ p["tc_w"] + p["tc_b"]                                 # (B, NP, OUT_CH)
    return patch2image(y)


if __name__ == "__main__":
    key = jax.random.PRNGKey(0)
    pkey, xkey = jax.random.split(key)
    params = init_params(pkey)
    slab = pack_params(params)          # one-time repack, outside the hot path
    x = jax.random.normal(xkey, (B, FEATURE_DIM), jnp.float32)

    out = jax.jit(forward)(x, slab)
    out = jax.block_until_ready(out)
    assert out.shape == (B, CHANNELS, IMAGE_SIZE, IMAGE_SIZE), out.shape
    assert bool(jnp.all(jnp.isfinite(out)))

    ref = jax.block_until_ready(jax.jit(reference_forward)(x, params))
    max_err = float(jnp.max(jnp.abs(out - ref)))
    assert max_err < 3e-2, f"kernel/reference mismatch: max abs err = {max_err}"

    print("KERNEL_OK")
</pallas_src>

<mosaic_0001>
module attributes {stable_mosaic.version = 11 : i64} {
  func.func @remixer_fused_kernel(%arg0: memref<32x64xf32, #tpu.memory_space<vmem>>, %arg1: memref<696x128xf32, #tpu.memory_space<vmem>>, %arg2: memref<16x128xf32, #tpu.memory_space<vmem>>) attributes {dimension_semantics = [], scalar_prefetch = 0 : i64, scratch_operands = 0 : i64, tpu.core_type = #tpu.core_type<tc>} {
    %c0 = arith.constant 0 : index
    %c0_0 = arith.constant 0 : index
    %0 = vector.load %arg1[%c0, %c0_0] : memref<696x128xf32, #tpu.memory_space<vmem>>, vector<32x32xf32>
    %c32 = arith.constant 32 : index
    %c0_1 = arith.constant 0 : index
    %1 = vector.load %arg1[%c32, %c0_1] : memref<696x128xf32, #tpu.memory_space<vmem>>, vector<32x64xf32>
    %c0_2 = arith.constant 0 : index
    %c0_3 = arith.constant 0 : index
    %2 = vector.load %arg0[%c0_2, %c0_3] : memref<32x64xf32, #tpu.memory_space<vmem>>, vector<32x64xf32>
    %cst = arith.constant dense<0.000000e+00> : vector<32x64xf32>
    %3 = tpu.matmul %0, %2, %cst {dimension_numbers = #tpu.dot_dimension_numbers<[1], [0], [0], [1], [0, 0, 1, 1], [], []>} : vector<32x32xf32>, vector<32x64xf32>, vector<32x64xf32> -> vector<32x64xf32>
    %4 = arith.addf %3, %1 : vector<32x64xf32>
    %5 = vector.extract_strided_slice %4 {offsets = [0, 0], sizes = [16, 64], strides = [1, 1]} : vector<32x64xf32> to vector<16x64xf32>
    %6 = vector.extract_strided_slice %4 {offsets = [16, 0], sizes = [16, 64], strides = [1, 1]} : vector<32x64xf32> to vector<16x64xf32>
    %c64 = arith.constant 64 : index
    %c0_4 = arith.constant 0 : index
    %7 = vector.load %arg1[%c64, %c0_4] : memref<696x128xf32, #tpu.memory_space<vmem>>, vector<16x16xf32>
    %c80 = arith.constant 80 : index
    %c0_5 = arith.constant 0 : index
    %8 = vector.load %arg1[%c80, %c0_5] : memref<696x128xf32, #tpu.memory_space<vmem>>, vector<128x128xf32>
    %9 = arith.mulf %6, %6 : vector<16x64xf32>
    %10 = tpu.concatenate %6, %9 in 1 : vector<16x64xf32>, vector<16x64xf32> -> vector<16x128xf32>
    %cst_6 = arith.constant dense<0.000000e+00> : vector<16x128xf32>
    %11 = tpu.matmul %7, %10, %cst_6 {dimension_numbers = #tpu.dot_dimension_numbers<[1], [0], [0], [1], [0, 0, 1, 1], [], []>, precision = #tpu.contract_precision<fp32>} : vector<16x16xf32>, vector<16x128xf32>, vector<16x128xf32> -> vector<16x128xf32>
    %12 = vector.extract_strided_slice %11 {offsets = [0, 0], sizes = [16, 64], strides = [1, 1]} : vector<16x128xf32> to vector<16x64xf32>
    %13 = vector.extract_strided_slice %11 {offsets = [0, 64], sizes = [16, 64], strides = [1, 1]} : vector<16x128xf32> to vector<16x64xf32>
    %14 = arith.mulf %12, %12 : vector<16x64xf32>
    %15 = arith.subf %13, %14 : vector<16x64xf32>
    %16 = arith.subf %6, %12 : vector<16x64xf32>
    %cst_7 = arith.constant 9.99999974E-6 : f32
    %17 = vector.broadcast %cst_7 : f32 to vector<16x64xf32>
    %18 = arith.addf %15, %17 : vector<16x64xf32>
    %19 = math.rsqrt %18 : vector<16x64xf32>
    %20 = arith.mulf %16, %19 : vector<16x64xf32>
    %c208 = arith.constant 208 : index
    %c0_8 = arith.constant 0 : index
    %21 = vector.load %arg1[%c208, %c0_8] : memref<696x128xf32, #tpu.memory_space<vmem>>, vector<16x16xf32>
    %cst_9 = arith.constant dense<0.000000e+00> : vector<16x64xf32>
    %22 = tpu.matmul %21, %20, %cst_9 {dimension_numbers = #tpu.dot_dimension_numbers<[1], [0], [0], [1], [0, 0, 1, 1], [], []>} : vector<16x16xf32>, vector<16x64xf32>, vector<16x64xf32> -> vector<16x64xf32>
    %c240 = arith.constant 240 : index
    %c0_10 = arith.constant 0 : index
    %23 = vector.load %arg1[%c240, %c0_10] : memref<696x128xf32, #tpu.memory_space<vmem>>, vector<16x1xf32>
    %24 = vector.broadcast %23 : vector<16x1xf32> to vector<16x64xf32>
    %25 = arith.addf %22, %24 : vector<16x64xf32>
    %cst_11 = arith.constant 5.000000e-01 : f32
    %26 = vector.broadcast %cst_11 : f32 to vector<16x64xf32>
    %27 = arith.mulf %26, %25 : vector<16x64xf32>
    %cst_12 = arith.constant 0.707106769 : f32
    %28 = vector.broadcast %cst_12 : f32 to vector<16x64xf32>
    %29 = arith.mulf %25, %28 : vector<16x64xf32>
    %30 = math.erf %29 : vector<16x64xf32>
    %cst_13 = arith.constant 1.000000e+00 : f32
    %31 = vector.broadcast %cst_13 : f32 to vector<16x64xf32>
    %32 = arith.addf %31, %30 : vector<16x64xf32>
    %33 = arith.mulf %27, %32 : vector<16x64xf32>
    %c224 = arith.constant 224 : index
    %c0_14 = arith.constant 0 : index
    %34 = vector.load %arg1[%c224, %c0_14] : memref<696x128xf32, #tpu.memory_space<vmem>>, vector<16x16xf32>
    %cst_15 = arith.constant dense<0.000000e+00> : vector<16x64xf32>
    %35 = tpu.matmul %34, %33, %cst_15 {dimension_numbers = #tpu.dot_dimension_numbers<[1], [0], [0], [1], [0, 0, 1, 1], [], []>} : vector<16x16xf32>, vector<16x64xf32>, vector<16x64xf32> -> vector<16x64xf32>
    %c256 = arith.constant 256 : index
    %c0_16 = arith.constant 0 : index
    %36 = vector.load %arg1[%c256, %c0_16] : memref<696x128xf32, #tpu.memory_space<vmem>>, vector<16x1xf32>
    %37 = vector.broadcast %36 : vector<16x1xf32> to vector<16x64xf32>
    %38 = arith.addf %35, %37 : vector<16x64xf32>
    %39 = arith.addf %5, %38 : vector<16x64xf32>
    %40 = arith.mulf %39, %39 : vector<16x64xf32>
    %41 = tpu.concatenate %39, %40 in 1 : vector<16x64xf32>, vector<16x64xf32> -> vector<16x128xf32>
    %cst_17 = arith.constant dense<0.000000e+00> : vector<16x128xf32>
    %42 = tpu.matmul %41, %8, %cst_17 {dimension_numbers = #tpu.dot_dimension_numbers<[1], [0], [0], [1], [0, 0, 1, 1], [], []>, precision = #tpu.contract_precision<fp32>} : vector<16x128xf32>, vector<128x128xf32>, vector<16x128xf32> -> vector<16x128xf32>
    %43 = vector.extract_strided_slice %42 {offsets = [0, 0], sizes = [16, 64], strides = [1, 1]} : vector<16x128xf32> to vector<16x64xf32>
    %44 = vector.extract_strided_slice %42 {offsets = [0, 64], sizes = [16, 64], strides = [1, 1]} : vector<16x128xf32> to vector<16x64xf32>
    %45 = arith.mulf %43, %43 : vector<16x64xf32>
    %46 = arith.subf %44, %45 : vector<16x64xf32>
    %47 = arith.subf %39, %43 : vector<16x64xf32>
    %cst_18 = arith.constant 9.99999974E-6 : f32
    %48 = vector.broadcast %cst_18 : f32 to vector<16x64xf32>
    %49 = arith.addf %46, %48 : vector<16x64xf32>
    %50 = math.rsqrt %49 : vector<16x64xf32>
    %51 = arith.mulf %47, %50 : vector<16x64xf32>
    %c272 = arith.constant 272 : index
    %c0_19 = arith.constant 0 : index
    %52 = vector.load %arg1[%c272, %c0_19] : memref<696x128xf32, #tpu.memory_space<vmem>>, vector<64x64xf32>
    %cst_20 = arith.constant dense<0.000000e+00> : vector<16x64xf32>
    %53 = tpu.matmul %51, %52, %cst_20 {dimension_numbers = #tpu.dot_dimension_numbers<[1], [0], [0], [1], [0, 0, 1, 1], [], []>} : vector<16x64xf32>, vector<64x64xf32>, vector<16x64xf32> -> vector<16x64xf32>
    %c400 = arith.constant 400 : index
    %c0_21 = arith.constant 0 : index
    %54 = vector.load %arg1[%c400, %c0_21] : memref<696x128xf32, #tpu.memory_space<vmem>>, vector<1x64xf32>
    %55 = vector.broadcast %54 : vector<1x64xf32> to vector<16x64xf32>
    %56 = arith.addf %53, %55 : vector<16x64xf32>
    %cst_22 = arith.constant 5.000000e-01 : f32
    %57 = vector.broadcast %cst_22 : f32 to vector<16x64xf32>
    %58 = arith.mulf %57, %56 : vector<16x64xf32>
    %cst_23 = arith.constant 0.707106769 : f32
    %59 = vector.broadcast %cst_23 : f32 to vector<16x64xf32>
    %60 = arith.mulf %56, %59 : vector<16x64xf32>
    %61 = math.erf %60 : vector<16x64xf32>
    %cst_24 = arith.constant 1.000000e+00 : f32
    %62 = vector.broadcast %cst_24 : f32 to vector<16x64xf32>
    %63 = arith.addf %62, %61 : vector<16x64xf32>
    %64 = arith.mulf %58, %63 : vector<16x64xf32>
    %c336 = arith.constant 336 : index
    %c0_25 = arith.constant 0 : index
    %65 = vector.load %arg1[%c336, %c0_25] : memref<696x128xf32, #tpu.memory_space<vmem>>, vector<64x64xf32>
    %cst_26 = arith.constant dense<0.000000e+00> : vector<16x64xf32>
    %66 = tpu.matmul %64, %65, %cst_26 {dimension_numbers = #tpu.dot_dimension_numbers<[1], [0], [0], [1], [0, 0, 1, 1], [], []>} : vector<16x64xf32>, vector<64x64xf32>, vector<16x64xf32> -> vector<16x64xf32>
    %c408 = arith.constant 408 : index
    %c0_27 = arith.constant 0 : index
    %67 = vector.load %arg1[%c408, %c0_27] : memref<696x128xf32, #tpu.memory_space<vmem>>, vector<1x64xf32>
    %68 = vector.broadcast %67 : vector<1x64xf32> to vector<16x64xf32>
    %69 = arith.addf %66, %68 : vector<16x64xf32>
    %70 = arith.addf %6, %69 : vector<16x64xf32>
    %71 = arith.mulf %70, %70 : vector<16x64xf32>
    %72 = tpu.concatenate %70, %71 in 1 : vector<16x64xf32>, vector<16x64xf32> -> vector<16x128xf32>
    %cst_28 = arith.constant dense<0.000000e+00> : vector<16x128xf32>
    %73 = tpu.matmul %7, %72, %cst_28 {dimension_numbers = #tpu.dot_dimension_numbers<[1], [0], [0], [1], [0, 0, 1, 1], [], []>, precision = #tpu.contract_precision<fp32>} : vector<16x16xf32>, vector<16x128xf32>, vector<16x128xf32> -> vector<16x128xf32>
    %74 = vector.extract_strided_slice %73 {offsets = [0, 0], sizes = [16, 64], strides = [1, 1]} : vector<16x128xf32> to vector<16x64xf32>
    %75 = vector.extract_strided_slice %73 {offsets = [0, 64], sizes = [16, 64], strides = [1, 1]} : vector<16x128xf32> to vector<16x64xf32>
    %76 = arith.mulf %74, %74 : vector<16x64xf32>
    %77 = arith.subf %75, %76 : vector<16x64xf32>
    %78 = arith.subf %70, %74 : vector<16x64xf32>
    %cst_29 = arith.constant 9.99999974E-6 : f32
    %79 = vector.broadcast %cst_29 : f32 to vector<16x64xf32>
    %80 = arith.addf %77, %79 : vector<16x64xf32>
    %81 = math.rsqrt %80 : vector<16x64xf32>
    %82 = arith.mulf %78, %81 : vector<16x64xf32>
    %c416 = arith.constant 416 : index
    %c0_30 = arith.constant 0 : index
    %83 = vector.load %arg1[%c416, %c0_30] : memref<696x128xf32, #tpu.memory_space<vmem>>, vector<16x16xf32>
    %cst_31 = arith.constant dense<0.000000e+00> : vector<16x64xf32>
    %84 = tpu.matmul %83, %82, %cst_31 {dimension_numbers = #tpu.dot_dimension_numbers<[1], [0], [0], [1], [0, 0, 1, 1], [], []>} : vector<16x16xf32>, vector<16x64xf32>, vector<16x64xf32> -> vector<16x64xf32>
    %c448 = arith.constant 448 : index
    %c0_32 = arith.constant 0 : index
    %85 = vector.load %arg1[%c448, %c0_32] : memref<696x128xf32, #tpu.memory_space<vmem>>, vector<16x1xf32>
    %86 = vector.broadcast %85 : vector<16x1xf32> to vector<16x64xf32>
    %87 = arith.addf %84, %86 : vector<16x64xf32>
    %cst_33 = arith.constant 5.000000e-01 : f32
    %88 = vector.broadcast %cst_33 : f32 to vector<16x64xf32>
    %89 = arith.mulf %88, %87 : vector<16x64xf32>
    %cst_34 = arith.constant 0.707106769 : f32
    %90 = vector.broadcast %cst_34 : f32 to vector<16x64xf32>
    %91 = arith.mulf %87, %90 : vector<16x64xf32>
    %92 = math.erf %91 : vector<16x64xf32>
    %cst_35 = arith.constant 1.000000e+00 : f32
    %93 = vector.broadcast %cst_35 : f32 to vector<16x64xf32>
    %94 = arith.addf %93, %92 : vector<16x64xf32>
    %95 = arith.mulf %89, %94 : vector<16x64xf32>
    %c432 = arith.constant 432 : index
    %c0_36 = arith.constant 0 : index
    %96 = vector.load %arg1[%c432, %c0_36] : memref<696x128xf32, #tpu.memory_space<vmem>>, vector<16x16xf32>
    %cst_37 = arith.constant dense<0.000000e+00> : vector<16x64xf32>
    %97 = tpu.matmul %96, %95, %cst_37 {dimension_numbers = #tpu.dot_dimension_numbers<[1], [0], [0], [1], [0, 0, 1, 1], [], []>} : vector<16x16xf32>, vector<16x64xf32>, vector<16x64xf32> -> vector<16x64xf32>
    %c464 = arith.constant 464 : index
    %c0_38 = arith.constant 0 : index
    %98 = vector.load %arg1[%c464, %c0_38] : memref<696x128xf32, #tpu.memory_space<vmem>>, vector<16x1xf32>
    %99 = vector.broadcast %98 : vector<16x1xf32> to vector<16x64xf32>
    %100 = arith.addf %97, %99 : vector<16x64xf32>
    %101 = arith.addf %39, %100 : vector<16x64xf32>
    %102 = arith.mulf %101, %101 : vector<16x64xf32>
    %103 = tpu.concatenate %101, %102 in 1 : vector<16x64xf32>, vector<16x64xf32> -> vector<16x128xf32>
    %cst_39 = arith.constant dense<0.000000e+00> : vector<16x128xf32>
    %104 = tpu.matmul %103, %8, %cst_39 {dimension_numbers = #tpu.dot_dimension_numbers<[1], [0], [0], [1], [0, 0, 1, 1], [], []>, precision = #tpu.contract_precision<fp32>} : vector<16x128xf32>, vector<128x128xf32>, vector<16x128xf32> -> vector<16x128xf32>
    %105 = vector.extract_strided_slice %104 {offsets = [0, 0], sizes = [16, 64], strides = [1, 1]} : vector<16x128xf32> to vector<16x64xf32>
    %106 = vector.extract_strided_slice %104 {offsets = [0, 64], sizes = [16, 64], strides = [1, 1]} : vector<16x128xf32> to vector<16x64xf32>
    %107 = arith.mulf %105, %105 : vector<16x64xf32>
    %108 = arith.subf %106, %107 : vector<16x64xf32>
    %109 = arith.subf %101, %105 : vector<16x64xf32>
    %cst_40 = arith.constant 9.99999974E-6 : f32
    %110 = vector.broadcast %cst_40 : f32 to vector<16x64xf32>
    %111 = arith.addf %108, %110 : vector<16x64xf32>
    %112 = math.rsqrt %111 : vector<16x64xf32>
    %113 = arith.mulf %109, %112 : vector<16x64xf32>
    %c480 = arith.constant 480 : index
    %c0_41 = arith.constant 0 : index
    %114 = vector.load %arg1[%c480, %c0_41] : memref<696x128xf32, #tpu.memory_space<vmem>>, vector<64x64xf32>
    %cst_42 = arith.constant dense<0.000000e+00> : vector<16x64xf32>
    %115 = tpu.matmul %113, %114, %cst_42 {dimension_numbers = #tpu.dot_dimension_numbers<[1], [0], [0], [1], [0, 0, 1, 1], [], []>} : vector<16x64xf32>, vector<64x64xf32>, vector<16x64xf32> -> vector<16x64xf32>
    %c608 = arith.constant 608 : index
    %c0_43 = arith.constant 0 : index
    %116 = vector.load %arg1[%c608, %c0_43] : memref<696x128xf32, #tpu.memory_space<vmem>>, vector<1x64xf32>
    %117 = vector.broadcast %116 : vector<1x64xf32> to vector<16x64xf32>
    %118 = arith.addf %115, %117 : vector<16x64xf32>
    %cst_44 = arith.constant 5.000000e-01 : f32
    %119 = vector.broadcast %cst_44 : f32 to vector<16x64xf32>
    %120 = arith.mulf %119, %118 : vector<16x64xf32>
    %cst_45 = arith.constant 0.707106769 : f32
    %121 = vector.broadcast %cst_45 : f32 to vector<16x64xf32>
    %122 = arith.mulf %118, %121 : vector<16x64xf32>
    %123 = math.erf %122 : vector<16x64xf32>
    %cst_46 = arith.constant 1.000000e+00 : f32
    %124 = vector.broadcast %cst_46 : f32 to vector<16x64xf32>
    %125 = arith.addf %124, %123 : vector<16x64xf32>
    %126 = arith.mulf %120, %125 : vector<16x64xf32>
    %c544 = arith.constant 544 : index
    %c0_47 = arith.constant 0 : index
    %127 = vector.load %arg1[%c544, %c0_47] : memref<696x128xf32, #tpu.memory_space<vmem>>, vector<64x64xf32>
    %cst_48 = arith.constant dense<0.000000e+00> : vector<16x64xf32>
    %128 = tpu.matmul %126, %127, %cst_48 {dimension_numbers = #tpu.dot_dimension_numbers<[1], [0], [0], [1], [0, 0, 1, 1], [], []>} : vector<16x64xf32>, vector<64x64xf32>, vector<16x64xf32> -> vector<16x64xf32>
    %c616 = arith.constant 616 : index
    %c0_49 = arith.constant 0 : index
    %129 = vector.load %arg1[%c616, %c0_49] : memref<696x128xf32, #tpu.memory_space<vmem>>, vector<1x64xf32>
    %130 = vector.broadcast %129 : vector<1x64xf32> to vector<16x64xf32>
    %131 = arith.addf %128, %130 : vector<16x64xf32>
    %132 = arith.addf %70, %131 : vector<16x64xf32>
    %133 = arith.addf %101, %132 : vector<16x64xf32>
    %cst_50 = arith.constant 5.000000e-01 : f32
    %134 = vector.broadcast %cst_50 : f32 to vector<16x64xf32>
    %135 = arith.mulf %133, %134 : vector<16x64xf32>
    %c624 = arith.constant 624 : index
    %c0_51 = arith.constant 0 : index
    %136 = vector.load %arg1[%c624, %c0_51] : memref<696x128xf32, #tpu.memory_space<vmem>>, vector<64x128xf32>
    %cst_52 = arith.constant dense<0.000000e+00> : vector<16x128xf32>
    %137 = tpu.matmul %135, %136, %cst_52 {dimension_numbers = #tpu.dot_dimension_numbers<[1], [0], [0], [1], [0, 0, 1, 1], [], []>} : vector<16x64xf32>, vector<64x128xf32>, vector<16x128xf32> -> vector<16x128xf32>
    %c688 = arith.constant 688 : index
    %c0_53 = arith.constant 0 : index
    %138 = vector.load %arg1[%c688, %c0_53] : memref<696x128xf32, #tpu.memory_space<vmem>>, vector<1x128xf32>
    %139 = vector.broadcast %138 : vector<1x128xf32> to vector<16x128xf32>
    %140 = arith.addf %137, %139 : vector<16x128xf32>
    %c0_54 = arith.constant 0 : index
    %c0_55 = arith.constant 0 : index
    %141 = vector.load %arg2[%c0_54, %c0_55] : memref<16x128xf32, #tpu.memory_space<vmem>>, vector<16x128xf32>
    tpu.vector_store %arg2[%c0_54, %c0_55], %140 {strides = array<i32>} : memref<16x128xf32, #tpu.memory_space<vmem>>, vector<16x128xf32>,
    return
  }
}

</mosaic_0001>

<bundles_post_ra>
// kernel: forward.1
= control target key start
LH: loop header
LB: loop body
LE: loop exit
PB: predicated region body
PF: predicated region fallthrough
CT: control target
= control target key end

     0   :  { %7 = vsyncpa [#allocation3], 0  ;;  %s4669_s9 = smov [#allocation2]   ;;  %s5494_s0 = inlined_call_operand.vmem [shape: f32[32,64], index: 0, kind: input, shape index: {}]   ;;  %s5495_s1 = inlined_call_operand.hbm [shape: f32[696,128], index: 1, kind: input, shape index: {}]   ;;  %s5496_s2 = inlined_call_operand.vmem [shape: f32[16,128], index: 2, kind: output, shape index: {}]  }
   0x1   :  { %s15_s10 = sshll.u32 %s4669_s9, 4  ;;  %s16_s10 = int_to_ptr.vmem [resolvable:$true] %s15_s10 }
   0x2   :  { %s4655_s11 = scalar_lea.vmem %s16_s10, 11136  ;;  %p4660_p1 = scmp.lt.s32.totalorder %s16_s10, %s16_s10 }
   0x3   :  { %p4656_p0 = scmp.ne.s32.totalorder %s16_s10, %s4655_s11  ;;  %p4661_p2 = scmp.lt.s32.totalorder %s4655_s11, %s4655_s11 }
   0x5   :  { %p4662_p3 = por %p4661_p2, %p4660_p1 }
   0x7   :  { %p4663_p4 = pnand %p4662_p3, %p4656_p0 }
   0x9   :  { %4666 = shalt.err (!%p4663_p4)
}
   0xa   :  { %s4670_s12 = smov 128   ;;  %s4671_s13 = smov 8  }
   0xb   :  { %21 = dma.hbm_to_vmem [thread:$0]  %s5495_s1, 11136, %s16_s10, [#allocation3], %s4670_s12, %s4670_s12, %s4671_s13  }
   0xc   :  { %4667 = dma.done.wait [#allocation3], 11136  }
   0xd   :  { %4668 = vsyncadd [#allocation3], 4294956160  ;;  %vm37_vm0 = vcmask 261120   ;;  %v36_v0 = vld [vmem:[%s5494_s0 + $0x18] sm:$0xff]  ;;  %v35_v1 = vld [vmem:[%s5494_s0 + $0x10] sm:$0xff]  ;;  %vm166_vm1 = vcmask 130048  }
   0xe   :  { %3967 = vmatprep.subr.mxu0 %v36_v0  ;;  %v25_v2 = vld [vmem:[#allocation2] sm:$0xff]  ;;  %v34_v3 = vld [vmem:[%s5494_s0 + $0x8] sm:$0xff]  ;;  %v27_v6 = vld [vmem:[#allocation2 + $0x10] sm:$0xff]  ;;  %vm163_vm2 = vcmask 523264  }
   0xf   :  { %3968 = vmatpush3.msra.mxu0 %v36_v0  ;;  %3975 = vmatprep.mubr.msk.f32.mxu0 %vm37_vm0, %v25_v2  ;;  %v33_v4 = vld [vmem:[%s5494_s0] sm:$0xff]  ;;  %v26_v5 = vld [vmem:[#allocation2 + $0x8] sm:$0xff]  ;;  %v28_v7 = vld [vmem:[#allocation2 + $0x18] sm:$0xff]  ;;  %s4672_s0 = smov 64  }
  0x10   :  { %3969 = vmatprep.subr.mxu0 %v35_v1  ;;  %v135_v8 = vld [vmem:[#allocation2 + $0x40] sm:$0xff]  ;;  %v32_v16 = vld [vmem:[#allocation2 + $0x38] sm:$0xff]  ;;  %v31_v19 = vld [vmem:[#allocation2 + $0x30] sm:$0xff] }
  0x11   :  { %3970 = vmatpush3.msra.mxu0 %v35_v1  ;;  %v168_v9 = vsel %vm166_vm1, %v135_v8, 0  ;;  %v136_v25 = vld [vmem:[#allocation2 + $0x48] sm:$0xff] }
  0x12   :  { %3971 = vmatprep.subr.mxu0 %v34_v3  ;;  %v4709_v10 = vand.u32 4294901760, %v168_v9  ;;  %v171_v26 = vsel %vm166_vm1, %v136_v25, 0  ;;  %v705_v25 = vld [vmem:[#allocation2 + $0xf0] sm:$0xff] }
  0x13   :  { %3972 = vmatpush3.msra.mxu0 %v34_v3  ;;  %v4738_v27 = vand.u32 4294901760, %v171_v26 }
  0x14   :  { %3973 = vmatprep.subr.mxu0 %v33_v4  ;;  %5563 = vst [vmem:[#allocation5_spill] sm:$0xff] %v4709_v10  ;;  %v4712_v11 = vsub.f32 %v168_v9, %v4709_v10  ;;  %3992 = vmatprep.mubr.f32.mxu1 %v4709_v10 }
  0x15   :  { %3974 = vmatpush3.msra.mxu0 %v33_v4  ;;  %5569 = vst [vmem:[#allocation11_spill] sm:$0xff] %v4738_v27  ;;  %v4741_v28 = vsub.f32 %v171_v26, %v4738_v27  ;;  %v811_v26 = vld [vmem:[#allocation2 + $0x108] sm:$0xff] }
  0x16   :  { %3976 = vmatmul.mubr.msk.f32.vlgmr.msra.gmra.mxu0 %vm37_vm0, %v26_v5  ;;  %5564 = vst [vmem:[#allocation6_spill] sm:$0xff] %v4712_v11  ;;  %v4716_v12 = vand.u32 4294901760, %v4712_v11 }
  0x17   :  { %3978 = vmatprep.mubr.msk.f32.mxu0 %vm37_vm0, %v27_v6  ;;  %5570 = vst [vmem:[#allocation12_spill] sm:$0xff] %v4741_v28  ;;  %v4744_v29 = vand.u32 4294901760, %v4741_v28 }
  0x18   :  { %5565 = vst [vmem:[#allocation7_spill] sm:$0xff] %v4716_v12  ;;  %v243_v14 = vsub.f32 %v4712_v11, %v4716_v12 }
  0x19   :  { %5571 = vst [vmem:[#allocation13_spill] sm:$0xff] %v4744_v29  ;;  %v253_v33 = vsub.f32 %v4741_v28, %v4744_v29 }
  0x1a   :  { %3979 = vmatmul.mubr.msk.f32.gmra.mxu0 %vm37_vm0, %v28_v7  ;;  %v4724_v17 = vand.u32 4294901760, %v243_v14 }
  0x1b   :  { %v4752_v38 = vand.u32 4294901760, %v253_v33 }
  0x1c   :  { %5566 = vst [vmem:[#allocation8_spill] sm:$0xff] %v4724_v17  ;;  %3985 = vmatprep.mubr.f32.mxu0 %v4724_v17 }
  0x1d   :  { %5572 = vst [vmem:[#allocation14_spill] sm:$0xff] %v4752_v38 }
  0xd6   :  { %v4718_v13 = vpop.f32.mrf.mxu0 }
  0xd8   :  { %v4722_v15 = vpop.f32.mrf.mxu0 }
  0xda   :  { %v3980_v18 = vpop.f32.mrf.mxu0 }
  0xdb   :  { %v4726_v20 = vadd.f32 %v3980_v18, %v32_v16  ;;  %v703_v18 = vld [vmem:[#allocation2 + $0xd0] sm:$0xff] }
  0xdc   :  { %v126_v21 = vpop.f32.mrf.mxu0 }
  0xdd   :  { %5567 = vst [vmem:[#allocation9_spill] sm:$0xff] %v4726_v20  ;;  %v4729_v22 = vadd.f32 %v126_v21, %v31_v19  ;;  %v154_v23 = vmul.f32 %v4726_v20, %v4726_v20  ;;  %v4673_v19 = vmov 0  }
  0xde   :  { %4613 = vset.pattern.permute.xlu0 %v4673_v19  ;;  %4614 = vset.pattern.permute.xlu1 %v4673_v19 }
  0xdf   :  { %5568 = vst [vmem:[#allocation10_spill] sm:$0xff] %v4729_v22  ;;  %159 = vrot.lane.b32.xlu0 %v154_v23, %s4672_s0  ;;  %v153_v24 = vmul.f32 %v4729_v22, %v4729_v22  ;;  %v706_v23 = vld [vmem:[#allocation2 + $0xf8] sm:$0xff] }
  0xe3   :  { %157 = vrot.lane.b32.xlu0 %v153_v24, %s4672_s0 }
 0x151   :  { %v160_v30 = vpop.permute.xlu0 %159 }
 0x152   :  { %v165_v31 = vsel %vm163_vm2, %v4726_v20, %v160_v30  ;;  %v810_v30 = vld [vmem:[#allocation2 + $0x100] sm:$0xff] }
 0x153   :  { %v202_v32 = vand.u32 4294901760, %v165_v31 }
 0x155   :  { %v290_v34 = vsub.f32 %v165_v31, %v202_v32  ;;  %3981 = vmatprep.subr.mxu0 %v202_v32  ;;  %v158_v35 = vpop.permute.xlu0 %157 }
 0x156   :  { %v164_v36 = vsel %vm163_vm2, %v4729_v22, %v158_v35  ;;  %3982 = vmatpush3.msra.mxu0 %v202_v32 }
 0x157   :  { %v205_v37 = vand.u32 4294901760, %v164_v36  ;;  %v291_v39 = vand.u32 4294901760, %v290_v34 }
 0x159   :  { %v297_v40 = vsub.f32 %v164_v36, %v205_v37  ;;  %3983 = vmatprep.subr.mxu0 %v205_v37  ;;  %v292_v41 = vsub.f32 %v290_v34, %v291_v39 }
 0x15a   :  { %3984 = vmatpush3.msra.mxu0 %v205_v37 }
 0x15b   :  { %4002 = vmatprep.subr.mxu0 %v202_v32  ;;  %3986 = vmatmul.mubr.f32.vlgmr.msra.gmra.mxu0 %v4752_v38  ;;  %v293_v42 = vand.u32 4294901760, %v292_v41  ;;  %v298_v43 = vand.u32 4294901760, %v297_v40 }
 0x15c   :  { %4003 = vmatpush3.msra.mxu0 %v202_v32  ;;  %4006 = vmatprep.mubr.f32.mxu0 %v4716_v12  ;;  %v29_v12 = vld [vmem:[#allocation2 + $0x20] sm:$0xff] }
 0x15d   :  { %3988 = vmatprep.subr.mxu1 %v293_v42  ;;  %4004 = vmatprep.subr.mxu0 %v205_v37  ;;  %v299_v44 = vsub.f32 %v297_v40, %v298_v43 }
 0x15e   :  { %3989 = vmatpush3.msra.mxu1 %v293_v42  ;;  %4005 = vmatpush3.msra.mxu0 %v205_v37 }
 0x15f   :  { %4016 = vmatprep.subr.mxu0 %v202_v32  ;;  %4007 = vmatmul.mubr.f32.vlgmr.msra.gmra.mxu0 %v4744_v29  ;;  %v300_v45 = vand.u32 4294901760, %v299_v44  ;;  %v30_v29 = vld [vmem:[#allocation2 + $0x28] sm:$0xff] }
 0x160   :  { %4017 = vmatpush3.msra.mxu0 %v202_v32  ;;  %4020 = vmatprep.mubr.f32.mxu0 %v4709_v10 }
 0x161   :  { %3990 = vmatprep.subr.mxu1 %v300_v45  ;;  %4018 = vmatprep.subr.mxu0 %v205_v37 }
 0x162   :  { %3991 = vmatpush3.msra.mxu1 %v300_v45  ;;  %4019 = vmatpush3.msra.mxu0 %v205_v37  ;;  %v704_v37 = vld [vmem:[#allocation2 + $0xd8] sm:$0xff] }
 0x163   :  { %3993 = vmatmul.mubr.f32.vlgmr.msra.gmra.mxu1 %v4738_v27  ;;  %3995 = vmatprep.subr.mxu1 %v290_v34 }
 0x164   :  { %3996 = vmatpush3.msra.mxu1 %v290_v34  ;;  %3999 = vmatprep.mubr.f32.mxu1 %v4712_v11 }
 0x165   :  { %3997 = vmatprep.subr.mxu1 %v297_v40  ;;  %4021 = vmatmul.mubr.f32.vlgmr.msra.gmra.mxu0 %v4738_v27 }
 0x166   :  { %3998 = vmatpush3.msra.mxu1 %v297_v40 }
 0x167   :  { %4000 = vmatmul.mubr.f32.vlgmr.msra.gmra.mxu1 %v4741_v28  ;;  %4009 = vmatprep.subr.mxu1 %v291_v39  ;;  %v122_v28 = vadd.f32 %v4718_v13, %v30_v29 }
 0x168   :  { %4010 = vmatpush3.msra.mxu1 %v291_v39  ;;  %4013 = vmatprep.mubr.f32.mxu1 %v4709_v10  ;;  %v808_v39 = vld [vmem:[#allocation2 + $0xe0] sm:$0xff] }
 0x169   :  { %4011 = vmatprep.subr.mxu1 %v298_v43  ;;  %4034 = vmatprep.mubr.msk.f32.mxu0 %vm166_vm1, %v808_v39  ;;  %v143_v39 = vld [vmem:[#allocation2 + $0x80] sm:$0xff] }
 0x16a   :  { %4012 = vmatpush3.msra.mxu1 %v298_v43 }
 0x16b   :  { %4014 = vmatmul.mubr.f32.vlgmr.msra.gmra.mxu1 %v4738_v27 }
 0x16c   :  { %4027 = vmatprep.mubr.msk.f32.mxu1 %vm166_vm1, %v703_v18 }
 0x21b   :  { %v3987_v46 = vpop.f32.mrf.mxu0 }
 0x21d   :  { %v246_v47 = vpop.f32.mrf.mxu0 }
 0x21f   :  { %v4008_v49 = vpop.f32.mrf.mxu0 }
 0x221   :  { %v501_v53 = vpop.f32.mrf.mxu0 }
 0x223   :  { %v3994_v48 = vpop.f32.mrf.mxu1 }
 0x224   :  { %v344_v51 = vadd.f32 %v3994_v48, %v3987_v46 }
 0x225   :  { %v337_v50 = vpop.f32.mrf.mxu1  ;;  %v4022_v60 = vpop.f32.mrf.mxu0 }
 0x226   :  { %v338_v54 = vadd.f32 %v337_v50, %v246_v47 }
 0x227   :  { %v4001_v52 = vpop.f32.mrf.mxu1  ;;  %v665_v2 = vpop.f32.mrf.mxu0 }
 0x228   :  { %v427_v55 = vadd.f32 %v4001_v52, %v344_v51 }
 0x229   :  { %v419_v56 = vpop.f32.mrf.mxu1 }
 0x22a   :  { %v510_v57 = vadd.f32 %v4008_v49, %v427_v55  ;;  %v420_v58 = vadd.f32 %v419_v56, %v338_v54  ;;  %v809_v56 = vld [vmem:[#allocation2 + $0xe8] sm:$0xff] }
 0x22b   :  { %v4015_v59 = vpop.f32.mrf.mxu1 }
 0x22c   :  { %v502_v61 = vadd.f32 %v501_v53, %v420_v58  ;;  %v593_v62 = vadd.f32 %v4015_v59, %v510_v57  ;;  %v152_v57 = vld [vmem:[#allocation2 + $0xc8] sm:$0xff]  ;;  %v151_v58 = vld [vmem:[#allocation2 + $0xc0] sm:$0xff]  ;;  %v150_v59 = vld [vmem:[#allocation2 + $0xb8] sm:$0xff] }
 0x22d   :  { %v586_v63 = vpop.f32.mrf.mxu1 }
 0x22e   :  { %v672_v0 = vadd.f32 %v4022_v60, %v593_v62  ;;  %v587_v1 = vadd.f32 %v586_v63, %v502_v61  ;;  %v4774_v60 = vand.u32 4294901760, %v152_v57  ;;  %v4776_v61 = vand.u32 4294901760, %v151_v58  ;;  %v149_v63 = vld [vmem:[#allocation2 + $0xb0] sm:$0xff] }
 0x22f   :  { %v4778_v62 = vand.u32 4294901760, %v150_v59 }
 0x230   :  { %v666_v3 = vadd.f32 %v665_v2, %v587_v1  ;;  %v676_v4 = vmul.f32 %v672_v0, %v672_v0  ;;  %v688_v31 = vsub.f32 %v4726_v20, %v672_v0  ;;  %v147_v1 = vld [vmem:[#allocation2 + $0xa0] sm:$0xff]  ;;  %v4780_v2 = vand.u32 4294901760, %v149_v63 }
 0x232   :  { %681 = vrot.lane.b32.xlu1 %v676_v4, %s4672_s0  ;;  %v675_v5 = vmul.f32 %v666_v3, %v666_v3  ;;  %v687_v34 = vsub.f32 %v4729_v22, %v666_v3  ;;  %v4784_v4 = vand.u32 4294901760, %v147_v1 }
 0x234   :  { %v4806_v19 = vsub.f32 %v147_v1, %v4784_v4 }
 0x236   :  { %679 = vrot.lane.b32.xlu1 %v675_v5, %s4672_s0  ;;  %v146_v5 = vld [vmem:[#allocation2 + $0x98] sm:$0xff] }
 0x2a4   :  { %v682_v6 = vpop.permute.xlu1 %681 }
 0x2a5   :  { %v686_v7 = vsub.f32 %v672_v0, %v682_v6  ;;  %v148_v0 = vld [vmem:[#allocation2 + $0xa8] sm:$0xff]  ;;  %v145_v6 = vld [vmem:[#allocation2 + $0x90] sm:$0xff] }
 0x2a7   :  { %v690_v8 = vadd.f32 1e-05, %v686_v7  ;;  %v4787_v7 = vsub.f32 %v152_v57, %v4774_v60 }
 0x2a8   :  { %v680_v9 = vpop.permute.xlu1 %679 }
 0x2a9   :  { %4615 = vrsqrt.f32 %v690_v8  ;;  %v685_v14 = vsub.f32 %v666_v3, %v680_v9  ;;  %v4782_v3 = vand.u32 4294901760, %v148_v0  ;;  %v4790_v8 = vsub.f32 %v151_v58, %v4776_v61 }
 0x2aa   :  { %v4793_v9 = vsub.f32 %v150_v59, %v4778_v62  ;;  %v139_v59 = vld [vmem:[#allocation2 + $0x60] sm:$0xff] }
 0x2ab   :  { %v689_v16 = vadd.f32 1e-05, %v685_v14  ;;  %v4796_v14 = vand.u32 4294901760, %v146_v5  ;;  %v4802_v18 = vsub.f32 %v148_v0, %v4782_v3 }
 0x2ad   :  { %4617 = vrsqrt.f32 %v689_v16  ;;  %v4799_v16 = vsub.f32 %v149_v63, %v4780_v2 }
 0x2b6   :  { %v4616_v21 = vpop.eup %4615 }
 0x2b7   :  { %697 = vrot.lane.b32.xlu0 %v4616_v21, %s4672_s0  ;;  %v4808_v21 = vand.u32 4294901760, %v145_v6 }
 0x2ba   :  { %v4618_v24 = vpop.eup %4617 }
 0x2bb   :  { %695 = vrot.lane.b32.xlu1 %v4618_v24, %s4672_s0  ;;  %714 = vperm.xlu0 %4613, %v706_v23   ;;  %v4811_v23 = vand.u32 4294901760, %v4787_v7  ;;  %v4814_v24 = vand.u32 4294901760, %v4790_v8 }
 0x2bf   :  { %709 = vperm.xlu1 %4614, %v705_v25   ;;  %819 = vperm.xlu0 %4613, %v811_v26   ;;  %v4817_v25 = vand.u32 4294901760, %v4793_v9  ;;  %v4821_v26 = vand.u32 4294901760, %v4799_v16 }
 0x2c3   :  { %814 = vperm.xlu1 %4614, %v810_v30   ;;  %v4824_v30 = vand.u32 4294901760, %v4802_v18 }
 0x329   :  { %v698_v32 = vpop.permute.xlu0 %697 }
 0x32a   :  { %v702_v33 = vmul.f32 %v698_v32, %v688_v31  ;;  %v4828_v31 = vsub.f32 %v146_v5, %v4796_v14  ;;  %v1022_v32 = vsub.f32 %v4787_v7, %v4811_v23 }
 0x32c   :  { %4023 = vmatprep.subr.mxu1 %v702_v33 }
 0x32d   :  { %4024 = vmatpush3.msra.mxu1 %v702_v33  ;;  %v696_v35 = vpop.permute.xlu1 %695  ;;  %v1029_v33 = vsub.f32 %v4790_v8, %v4814_v24 }
 0x32e   :  { %v701_v36 = vmul.f32 %v696_v35, %v687_v34  ;;  %v1036_v34 = vsub.f32 %v4793_v9, %v4817_v25  ;;  %v4838_v35 = vand.u32 4294901760, %v4806_v19 }
 0x330   :  { %4025 = vmatprep.subr.mxu1 %v701_v36  ;;  %5573 = vst [vmem:[#allocation15_spill] sm:$0xff] %v4838_v35 }
 0x331   :  { %4026 = vmatpush3.msra.mxu1 %v701_v36  ;;  %v4842_v36 = vsub.f32 %v145_v6, %v4808_v21 }
 0x332   :  { %4028 = vmatmul.mubr.msk.f32.vlgmr.msra.gmra.mxu1 %vm166_vm1, %v704_v37  ;;  %4037 = vmatprep.subr.mxu1 %v4774_v60  ;;  %v144_v37 = vld [vmem:[#allocation2 + $0x88] sm:$0xff] }
 0x333   :  { %4038 = vmatpush3.msra.mxu1 %v4774_v60 }
 0x334   :  { %4039 = vmatprep.subr.mxu1 %v4776_v61 }
 0x335   :  { %4040 = vmatpush3.msra.mxu1 %v4776_v61 }
 0x336   :  { %v715_v40 = vpop.permute.xlu0 %714  ;;  %4041 = vmatprep.subr.mxu1 %v4778_v62 }
 0x337   :  { %4042 = vmatpush3.msra.mxu1 %v4778_v62 }
 0x338   :  { %4043 = vmatprep.subr.mxu1 %v4780_v2 }
 0x339   :  { %4044 = vmatpush3.msra.mxu1 %v4780_v2 }
 0x33a   :  { %v710_v43 = vpop.permute.xlu1 %709  ;;  %4045 = vmatprep.subr.mxu1 %v4782_v3  ;;  %v820_v27 = vpop.permute.xlu0 %819 }
 0x33b   :  { %4046 = vmatpush3.msra.mxu1 %v4782_v3 }
 0x33c   :  { %4047 = vmatprep.subr.mxu1 %v4784_v4 }
 0x33d   :  { %4048 = vmatpush3.msra.mxu1 %v4784_v4 }
 0x33e   :  { %4049 = vmatprep.subr.mxu1 %v4796_v14  ;;  %v815_v38 = vpop.permute.xlu1 %814 }
 0x33f   :  { %4050 = vmatpush3.msra.mxu1 %v4796_v14 }
 0x340   :  { %4051 = vmatprep.subr.mxu1 %v4808_v21 }
 0x341   :  { %4052 = vmatpush3.msra.mxu1 %v4808_v21 }
 0x3f2   :  { %v4029_v41 = vpop.f32.mrf.mxu1 }
 0x3f3   :  { %v795_v42 = vadd.f32 %v4029_v41, %v715_v40  ;;  %v142_v40 = vld [vmem:[#allocation2 + $0x78] sm:$0xff]  ;;  %v4844_v41 = vand.u32 4294901760, %v1022_v32 }
 0x3f4   :  { %v789_v44 = vpop.f32.mrf.mxu1 }
 0x3f5   :  { %v801_v45 = vmul.f32 0.70710677, %v795_v42  ;;  %v790_v46 = vadd.f32 %v789_v44, %v710_v43  ;;  %v799_v49 = vmul.f32 0.5, %v795_v42  ;;  %5574 = vst [vmem:[#allocation16_spill] sm:$0xff] %v4844_v41  ;;  %v4846_v42 = vand.u32 4294901760, %v1029_v33 }
 0x3f6   :  { %v1043_v43 = vsub.f32 %v4799_v16, %v4821_v26  ;;  %v1050_v44 = vsub.f32 %v4802_v18, %v4824_v30 }
 0x3f7   :  { %4619 = verf.f32 %v801_v45  ;;  %v800_v47 = vmul.f32 0.70710677, %v790_v46  ;;  %v798_v52 = vmul.f32 0.5, %v790_v46  ;;  %5575 = vst [vmem:[#allocation17_spill] sm:$0xff] %v4846_v42  ;;  %v4854_v45 = vand.u32 4294901760, %v4828_v31  ;;  %v141_v46 = vld [vmem:[#allocation2 + $0x70] sm:$0xff] }
 0x3f8   :  { %v4884_v57 = vand.u32 4294901760, %v141_v46  ;;  %v4891_v63 = vand.u32 4294901760, %v1050_v44 }
 0x3f9   :  { %4621 = verf.f32 %v800_v47  ;;  %5576 = vst [vmem:[#allocation18_spill] sm:$0xff] %v4854_v45  ;;  %v4858_v47 = vand.u32 4294901760, %v1036_v34  ;;  %v1064_v58 = vsub.f32 %v4828_v31, %v4854_v45 }
 0x3fa   :  { %5580 = vst [vmem:[#allocation22_spill] sm:$0xff] %v4891_v63  ;;  %v4914_v34 = vsub.f32 %v141_v46, %v4884_v57 }
 0x3fb   :  { %5577 = vst [vmem:[#allocation19_spill] sm:$0xff] %v4858_v47 }
 0x404   :  { %v4620_v48 = vpop.eup %4619 }
 0x405   :  { %v805_v50 = vadd.f32 1.0, %v4620_v48  ;;  %v4861_v48 = vand.u32 4294901760, %v144_v37 }
 0x406   :  { %v4622_v51 = vpop.eup %4621 }
 0x407   :  { %v807_v53 = vmul.f32 %v805_v50, %v799_v49  ;;  %v804_v54 = vadd.f32 1.0, %v4622_v51  ;;  %v4863_v49 = vand.u32 4294901760, %v143_v39  ;;  %v4865_v50 = vand.u32 4294901760, %v142_v40  ;;  %4053 = vmatprep.subr.mxu1 %v4861_v48 }
 0x408   :  { %v1057_v51 = vsub.f32 %v4806_v19, %v4838_v35  ;;  %4054 = vmatpush3.msra.mxu1 %v4861_v48 }
 0x409   :  { %4030 = vmatprep.subr.mxu0 %v807_v53  ;;  %v806_v55 = vmul.f32 %v804_v54, %v798_v52  ;;  %v4871_v52 = vand.u32 4294901760, %v4842_v36  ;;  %v4875_v54 = vand.u32 4294901760, %v1043_v43  ;;  %v4898_v1 = vsub.f32 %v142_v40, %v4865_v50  ;;  %4055 = vmatprep.subr.mxu1 %v4863_v49 }
 0x40a   :  { %4031 = vmatpush3.msra.mxu0 %v807_v53  ;;  %v140_v53 = vld [vmem:[#allocation2 + $0x68] sm:$0xff]  ;;  %v4903_v6 = vand.u32 4294901760, %v1057_v51  ;;  %4056 = vmatpush3.msra.mxu1 %v4863_v49 }
 0x40b   :  { %4032 = vmatprep.subr.mxu0 %v806_v55  ;;  %5578 = vst [vmem:[#allocation20_spill] sm:$0xff] %v4871_v52  ;;  %5579 = vst [vmem:[#allocation21_spill] sm:$0xff] %v4875_v54  ;;  %v4900_v5 = vand.u32 4294901760, %v140_v53  ;;  %v1071_v32 = vsub.f32 %v4842_v36, %v4871_v52  ;;  %v4926_v43 = vand.u32 4294901760, %v4898_v1  ;;  %4057 = vmatprep.subr.mxu1 %v4865_v50 }
 0x40c   :  { %4033 = vmatpush3.msra.mxu0 %v806_v55  ;;  %v4878_v55 = vsub.f32 %v144_v37, %v4861_v48  ;;  %5582 = vst [vmem:[#allocation24_spill] sm:$0xff] %v4903_v6  ;;  %v4916_v37 = vand.u32 4294901760, %v139_v59  ;;  %4058 = vmatpush3.msra.mxu1 %v4865_v50 }
 0x40d   :  { %4035 = vmatmul.mubr.msk.f32.vlgmr.msra.gmra.mxu0 %vm166_vm1, %v809_v56  ;;  %4072 = vmatprep.subr.mxu0 %v4844_v41  ;;  %v4882_v56 = vsub.f32 %v143_v39, %v4863_v49  ;;  %v4921_v39 = vand.u32 4294901760, %v1064_v58  ;;  %5585 = vst [vmem:[#allocation27_spill] sm:$0xff] %v4926_v43  ;;  %v4930_v44 = vsub.f32 %v140_v53, %v4900_v5  ;;  %v4935_v46 = vand.u32 4294901760, %v1071_v32 }
 0x40e   :  { %4073 = vmatpush3.msra.mxu0 %v4844_v41  ;;  %v4894_v0 = vand.u32 4294901760, %v4878_v55  ;;  %v4940_v58 = vand.u32 4294901760, %v4914_v34  ;;  %v1092_v32 = vsub.f32 %v4898_v1, %v4926_v43  ;;  %4059 = vmatprep.subr.mxu1 %v4884_v57 }
 0x40f   :  { %4074 = vmatprep.subr.mxu0 %v4846_v42  ;;  %v4910_v33 = vand.u32 4294901760, %v4882_v56  ;;  %5584 = vst [vmem:[#allocation26_spill] sm:$0xff] %v4921_v39  ;;  %5586 = vst [vmem:[#allocation28_spill] sm:$0xff] %v4935_v46  ;;  %4060 = vmatpush3.msra.mxu1 %v4884_v57 }
 0x410   :  { %4075 = vmatpush3.msra.mxu0 %v4846_v42  ;;  %5581 = vst [vmem:[#allocation23_spill] sm:$0xff] %v4894_v0  ;;  %v1078_v40 = vsub.f32 %v4878_v55, %v4894_v0  ;;  %5587 = vst [vmem:[#allocation29_spill] sm:$0xff] %v4940_v58  ;;  %4061 = vmatprep.subr.mxu1 %v4900_v5 }
 0x411   :  { %4076 = vmatprep.subr.mxu0 %v4858_v47  ;;  %5583 = vst [vmem:[#allocation25_spill] sm:$0xff] %v4910_v33  ;;  %v1085_v51 = vsub.f32 %v4882_v56, %v4910_v33  ;;  %4062 = vmatpush3.msra.mxu1 %v4900_v5 }
 0x412   :  { %4077 = vmatpush3.msra.mxu0 %v4858_v47  ;;  %v4949_v53 = vand.u32 4294901760, %v1078_v40  ;;  %v1099_v40 = vsub.f32 %v4914_v34, %v4940_v58  ;;  %4063 = vmatprep.subr.mxu1 %v4916_v37 }
 0x413   :  { %4078 = vmatprep.subr.mxu0 %v4875_v54  ;;  %4064 = vmatpush3.msra.mxu1 %v4916_v37 }
 0x414   :  { %4079 = vmatpush3.msra.mxu0 %v4875_v54  ;;  %v4944_v54 = vsub.f32 %v139_v59, %v4916_v37  ;;  %5588 = vst [vmem:[#allocation30_spill] sm:$0xff] %v4949_v53  ;;  %v4960_v59 = vand.u32 4294901760, %v1085_v51  ;;  %v4979_v47 = vand.u32 4294901760, %v1099_v40  ;;  %v138_v40 = vld [vmem:[#allocation2 + $0x58] sm:$0xff] }
 0x415   :  { %4080 = vmatprep.subr.mxu0 %v4891_v63 }
 0x416   :  { %4081 = vmatpush3.msra.mxu0 %v4891_v63  ;;  %v4954_v63 = vand.u32 4294901760, %v4930_v44  ;;  %5590 = vst [vmem:[#allocation32_spill] sm:$0xff] %v4960_v59  ;;  %5593 = vst [vmem:[#allocation35_spill] sm:$0xff] %v4979_v47 }
 0x417   :  { %4082 = vmatprep.subr.mxu0 %v4903_v6 }
 0x418   :  { %4083 = vmatpush3.msra.mxu0 %v4903_v6  ;;  %5589 = vst [vmem:[#allocation31_spill] sm:$0xff] %v4954_v63  ;;  %v4965_v6 = vand.u32 4294901760, %v4944_v54  ;;  %v1106_v51 = vsub.f32 %v4930_v44, %v4954_v63 }
 0x419   :  { %4084 = vmatprep.subr.mxu0 %v4921_v39 }
 0x41a   :  { %4085 = vmatpush3.msra.mxu0 %v4921_v39  ;;  %5591 = vst [vmem:[#allocation33_spill] sm:$0xff] %v4965_v6  ;;  %v4971_v39 = vand.u32 4294901760, %v1092_v32  ;;  %v4987_v32 = vand.u32 4294901760, %v1106_v51  ;;  %v137_v51 = vld [vmem:[#allocation2 + $0x50] sm:$0xff] }
 0x41b   :  { %4086 = vmatprep.subr.mxu0 %v4935_v46  ;;  %v5003_v42 = vand.u32 4294901760, %v137_v51 }
 0x41c   :  { %4087 = vmatpush3.msra.mxu0 %v4935_v46  ;;  %5592 = vst [vmem:[#allocation34_spill] sm:$0xff] %v4971_v39  ;;  %v1113_v46 = vsub.f32 %v4944_v54, %v4965_v6  ;;  %5594 = vst [vmem:[#allocation36_spill] sm:$0xff] %v4987_v32 }
 0x41d   :  { %4088 = vmatprep.subr.mxu0 %v4949_v53 }
 0x41e   :  { %4089 = vmatpush3.msra.mxu0 %v4949_v53  ;;  %v4991_v53 = vand.u32 4294901760, %v1113_v46 }
 0x41f   :  { %4090 = vmatprep.subr.mxu0 %v4960_v59 }
 0x420   :  { %4091 = vmatpush3.msra.mxu0 %v4960_v59  ;;  %5595 = vst [vmem:[#allocation37_spill] sm:$0xff] %v4991_v53  ;;  %v4998_v59 = vand.u32 4294901760, %v138_v40 }
 0x421   :  { %4092 = vmatprep.subr.mxu0 %v4971_v39 }
 0x422   :  { %4093 = vmatpush3.msra.mxu0 %v4971_v39  ;;  %v5001_v39 = vsub.f32 %v138_v40, %v4998_v59  ;;  %4065 = vmatprep.subr.mxu1 %v4998_v59 }
 0x423   :  { %4094 = vmatprep.subr.mxu0 %v4979_v47  ;;  %4066 = vmatpush3.msra.mxu1 %v4998_v59 }
 0x424   :  { %4095 = vmatpush3.msra.mxu0 %v4979_v47  ;;  %v5008_v46 = vand.u32 4294901760, %v5001_v39  ;;  %4067 = vmatprep.subr.mxu1 %v5003_v42 }
 0x425   :  { %4096 = vmatprep.subr.mxu0 %v4987_v32  ;;  %4068 = vmatpush3.msra.mxu1 %v5003_v42 }
 0x426   :  { %4097 = vmatpush3.msra.mxu0 %v4987_v32  ;;  %5596 = vst [vmem:[#allocation38_spill] sm:$0xff] %v5008_v46  ;;  %v5011_v32 = vsub.f32 %v137_v51, %v5003_v42  ;;  %v1120_v40 = vsub.f32 %v5001_v39, %v5008_v46  ;;  %4107 = vmatprep.subr.mxu1 %v4787_v7 }
 0x427   :  { %4098 = vmatprep.subr.mxu0 %v4991_v53 }
 0x428   :  { %4099 = vmatpush3.msra.mxu0 %v4991_v53  ;;  %v5018_v53 = vand.u32 4294901760, %v5011_v32  ;;  %v5021_v47 = vand.u32 4294901760, %v1120_v40 }
 0x42a   :  { %5597 = vst [vmem:[#allocation39_spill] sm:$0xff] %v5018_v53  ;;  %5598 = vst [vmem:[#allocation40_spill] sm:$0xff] %v5021_v47  ;;  %v1127_v41 = vsub.f32 %v5011_v32, %v5018_v53  ;;  %4100 = vmatprep.subr.mxu0 %v5021_v47 }
 0x42b   :  { %4101 = vmatpush3.msra.mxu0 %v5021_v47 }
 0x42c   :  { %v5026_v51 = vand.u32 4294901760, %v1127_v41  ;;  %v117_v41 = vadd.f32 %v4722_v15, %v29_v12 }
 0x42e   :  { %5599 = vst [vmem:[#allocation41_spill] sm:$0xff] %v5026_v51  ;;  %4102 = vmatprep.subr.mxu0 %v5026_v51 }
 0x42f   :  { %4103 = vmatpush3.msra.mxu0 %v5026_v51 }
 0x430   :  { %4142 = vmatprep.subr.mxu0 %v4774_v60 }
 0x4cd   :  { %v4036_v40 = vpop.f32.mrf.mxu0 }
 0x4ce   :  { %v900_v11 = vadd.f32 %v4036_v40, %v820_v27 }
 0x4cf   :  { %v894_v22 = vpop.f32.mrf.mxu0 }
 0x4d0   :  { %v5034_v20 = vadd.f32 %v900_v11, %v122_v28  ;;  %v895_v47 = vadd.f32 %v894_v22, %v815_v38 }
 0x4d2   :  { %v5036_v10 = vadd.f32 %v895_v47, %v117_v41  ;;  %v906_v51 = vmul.f32 %v5034_v20, %v5034_v20 }
 0x4d4   :  { %911 = vrot.lane.b32.xlu0 %v906_v51, %s4672_s0  ;;  %v905_v17 = vmul.f32 %v5036_v10, %v5036_v10 }
 0x4d6   :  { %909 = vrot.lane.b32.xlu1 %v905_v17, %s4672_s0 }
 0x546   :  { %v912_v13 = vpop.permute.xlu0 %911 }
 0x547   :  { %v916_v27 = vsel %vm163_vm2, %v5034_v20, %v912_v13 }
 0x548   :  { %v5046_v12 = vand.u32 4294901760, %v916_v27  ;;  %v910_v11 = vpop.permute.xlu1 %909 }
 0x549   :  { %v915_v15 = vsel %vm163_vm2, %v5036_v10, %v910_v11 }
 0x54a   :  { %v5051_v22 = vsub.f32 %v916_v27, %v5046_v12  ;;  %v5053_v28 = vand.u32 4294901760, %v915_v15 }
 0x54c   :  { %v1010_v29 = vand.u32 4294901760, %v5051_v22  ;;  %v999_v38 = vsub.f32 %v915_v15, %v5053_v28  ;;  %4104 = vmatprep.mubr.f32.mxu0 %v5053_v28 }
 0x54d   :  { %4105 = vmatmul.mubr.f32.vlgmr.msra.gmra.mxu0 %v5046_v12 }
 0x54e   :  { %4143 = vmatpush3.msra.mxu0 %v4774_v60  ;;  %v1000_v17 = vand.u32 4294901760, %v999_v38  ;;  %v1011_v47 = vsub.f32 %v5051_v22, %v1010_v29 }
 0x54f   :  { %4144 = vmatprep.subr.mxu0 %v4776_v61 }
 0x550   :  { %4145 = vmatpush3.msra.mxu0 %v4776_v61  ;;  %4174 = vmatprep.mubr.f32.mxu0 %v1000_v17  ;;  %v1001_v51 = vsub.f32 %v999_v38, %v1000_v17  ;;  %v1012_v41 = vand.u32 4294901760, %v1011_v47 }
 0x551   :  { %4146 = vmatprep.subr.mxu0 %v4778_v62 }
 0x552   :  { %4147 = vmatpush3.msra.mxu0 %v4778_v62  ;;  %v1002_v40 = vand.u32 4294901760, %v1001_v51 }
 0x553   :  { %4148 = vmatprep.subr.mxu0 %v4780_v2 }
 0x554   :  { %4149 = vmatpush3.msra.mxu0 %v4780_v2  ;;  %4069 = vmatprep.mubr.f32.mxu1 %v1002_v40 }
 0x555   :  { %4150 = vmatprep.subr.mxu0 %v4782_v3  ;;  %4070 = vmatmul.mubr.f32.vlgmr.msra.gmra.mxu1 %v1012_v41 }
 0x556   :  { %4108 = vmatpush3.msra.mxu1 %v4787_v7  ;;  %4151 = vmatpush3.msra.mxu0 %v4782_v3 }
 0x557   :  { %4109 = vmatprep.subr.mxu1 %v4790_v8  ;;  %4139 = vmatprep.mubr.f32.mxu1 %v999_v38 }
 0x558   :  { %4152 = vmatprep.subr.mxu0 %v4784_v4  ;;  %4110 = vmatpush3.msra.mxu1 %v4790_v8 }
 0x559   :  { %4153 = vmatpush3.msra.mxu0 %v4784_v4  ;;  %4111 = vmatprep.subr.mxu1 %v4793_v9 }
 0x55a   :  { %4154 = vmatprep.subr.mxu0 %v4796_v14  ;;  %4112 = vmatpush3.msra.mxu1 %v4793_v9 }
 0x55b   :  { %4155 = vmatpush3.msra.mxu0 %v4796_v14  ;;  %4113 = vmatprep.subr.mxu1 %v4799_v16 }
 0x55c   :  { %4156 = vmatprep.subr.mxu0 %v4808_v21  ;;  %4114 = vmatpush3.msra.mxu1 %v4799_v16 }
 0x55d   :  { %4157 = vmatpush3.msra.mxu0 %v4808_v21  ;;  %4115 = vmatprep.subr.mxu1 %v4802_v18 }
 0x55e   :  { %4158 = vmatprep.subr.mxu0 %v4861_v48  ;;  %4116 = vmatpush3.msra.mxu1 %v4802_v18 }
 0x55f   :  { %4159 = vmatpush3.msra.mxu0 %v4861_v48  ;;  %4117 = vmatprep.subr.mxu1 %v4806_v19 }
 0x560   :  { %4160 = vmatprep.subr.mxu0 %v4863_v49  ;;  %4118 = vmatpush3.msra.mxu1 %v4806_v19 }
 0x561   :  { %4161 = vmatpush3.msra.mxu0 %v4863_v49  ;;  %4119 = vmatprep.subr.mxu1 %v4828_v31 }
 0x562   :  { %4162 = vmatprep.subr.mxu0 %v4865_v50  ;;  %4120 = vmatpush3.msra.mxu1 %v4828_v31 }
 0x563   :  { %4163 = vmatpush3.msra.mxu0 %v4865_v50  ;;  %4121 = vmatprep.subr.mxu1 %v4842_v36 }
 0x564   :  { %4164 = vmatprep.subr.mxu0 %v4884_v57  ;;  %4122 = vmatpush3.msra.mxu1 %v4842_v36 }
 0x565   :  { %4165 = vmatpush3.msra.mxu0 %v4884_v57  ;;  %4123 = vmatprep.subr.mxu1 %v4878_v55 }
 0x566   :  { %4166 = vmatprep.subr.mxu0 %v4900_v5  ;;  %4124 = vmatpush3.msra.mxu1 %v4878_v55 }
 0x567   :  { %4167 = vmatpush3.msra.mxu0 %v4900_v5  ;;  %4125 = vmatprep.subr.mxu1 %v4882_v56 }
 0x568   :  { %4168 = vmatprep.subr.mxu0 %v4916_v37  ;;  %4126 = vmatpush3.msra.mxu1 %v4882_v56 }
 0x569   :  { %4169 = vmatpush3.msra.mxu0 %v4916_v37  ;;  %4127 = vmatprep.subr.mxu1 %v4898_v1 }
 0x56a   :  { %4170 = vmatprep.subr.mxu0 %v4998_v59  ;;  %4128 = vmatpush3.msra.mxu1 %v4898_v1 }
 0x56b   :  { %4171 = vmatpush3.msra.mxu0 %v4998_v59  ;;  %4129 = vmatprep.subr.mxu1 %v4914_v34 }
 0x56c   :  { %4172 = vmatprep.subr.mxu0 %v5003_v42  ;;  %4130 = vmatpush3.msra.mxu1 %v4914_v34 }
 0x56d   :  { %4173 = vmatpush3.msra.mxu0 %v5003_v42  ;;  %4131 = vmatprep.subr.mxu1 %v4930_v44 }
 0x56e   :  { %4175 = vmatmul.mubr.f32.vlgmr.msra.gmra.mxu0 %v1010_v29  ;;  %4212 = vmatprep.subr.mxu0 %v4774_v60 }
 0x56f   :  { %4132 = vmatpush3.msra.mxu1 %v4930_v44  ;;  %4213 = vmatpush3.msra.mxu0 %v4774_v60 }
 0x570   :  { %4244 = vmatprep.mubr.f32.mxu0 %v5053_v28  ;;  %4133 = vmatprep.subr.mxu1 %v4944_v54 }
 0x571   :  { %4214 = vmatprep.subr.mxu0 %v4776_v61  ;;  %4134 = vmatpush3.msra.mxu1 %v4944_v54 }
 0x572   :  { %4215 = vmatpush3.msra.mxu0 %v4776_v61  ;;  %4135 = vmatprep.subr.mxu1 %v5001_v39 }
 0x573   :  { %4216 = vmatprep.subr.mxu0 %v4778_v62  ;;  %4136 = vmatpush3.msra.mxu1 %v5001_v39 }
 0x574   :  { %4217 = vmatpush3.msra.mxu0 %v4778_v62  ;;  %4137 = vmatprep.subr.mxu1 %v5011_v32 }
 0x575   :  { %4218 = vmatprep.subr.mxu0 %v4780_v2  ;;  %4138 = vmatpush3.msra.mxu1 %v5011_v32 }
 0x576   :  { %4219 = vmatpush3.msra.mxu0 %v4780_v2  ;;  %4140 = vmatmul.mubr.f32.vlgmr.msra.gmra.mxu1 %v5051_v22 }
 0x577   :  { %4177 = vmatprep.subr.mxu1 %v4811_v23  ;;  %4220 = vmatprep.subr.mxu0 %v4782_v3 }
 0x578   :  { %4178 = vmatpush3.msra.mxu1 %v4811_v23  ;;  %4209 = vmatprep.mubr.f32.mxu1 %v5053_v28 }
 0x579   :  { %4221 = vmatpush3.msra.mxu0 %v4782_v3  ;;  %4179 = vmatprep.subr.mxu1 %v4814_v24 }
 0x57a   :  { %4222 = vmatprep.subr.mxu0 %v4784_v4  ;;  %4180 = vmatpush3.msra.mxu1 %v4814_v24 }
 0x57b   :  { %4223 = vmatpush3.msra.mxu0 %v4784_v4  ;;  %4181 = vmatprep.subr.mxu1 %v4817_v25 }
 0x57c   :  { %4224 = vmatprep.subr.mxu0 %v4796_v14  ;;  %4182 = vmatpush3.msra.mxu1 %v4817_v25 }
 0x57d   :  { %4225 = vmatpush3.msra.mxu0 %v4796_v14  ;;  %4183 = vmatprep.subr.mxu1 %v4821_v26 }
 0x57e   :  { %4226 = vmatprep.subr.mxu0 %v4808_v21  ;;  %4184 = vmatpush3.msra.mxu1 %v4821_v26 }
 0x57f   :  { %4227 = vmatpush3.msra.mxu0 %v4808_v21  ;;  %4185 = vmatprep.subr.mxu1 %v4824_v30 }
 0x580   :  { %4228 = vmatprep.subr.mxu0 %v4861_v48  ;;  %4186 = vmatpush3.msra.mxu1 %v4824_v30 }
 0x581   :  { %4229 = vmatpush3.msra.mxu0 %v4861_v48  ;;  %4187 = vmatprep.subr.mxu1 %v4838_v35 }
 0x582   :  { %4230 = vmatprep.subr.mxu0 %v4863_v49  ;;  %4188 = vmatpush3.msra.mxu1 %v4838_v35 }
 0x583   :  { %4231 = vmatpush3.msra.mxu0 %v4863_v49  ;;  %4189 = vmatprep.subr.mxu1 %v4854_v45 }
 0x584   :  { %4232 = vmatprep.subr.mxu0 %v4865_v50  ;;  %4190 = vmatpush3.msra.mxu1 %v4854_v45 }
 0x585   :  { %4233 = vmatpush3.msra.mxu0 %v4865_v50  ;;  %4191 = vmatprep.subr.mxu1 %v4871_v52 }
 0x586   :  { %4234 = vmatprep.subr.mxu0 %v4884_v57  ;;  %4192 = vmatpush3.msra.mxu1 %v4871_v52 }
 0x587   :  { %4235 = vmatpush3.msra.mxu0 %v4884_v57  ;;  %4193 = vmatprep.subr.mxu1 %v4894_v0 }
 0x588   :  { %4236 = vmatprep.subr.mxu0 %v4900_v5  ;;  %4194 = vmatpush3.msra.mxu1 %v4894_v0 }
 0x589   :  { %4237 = vmatpush3.msra.mxu0 %v4900_v5  ;;  %4195 = vmatprep.subr.mxu1 %v4910_v33 }
 0x58a   :  { %4238 = vmatprep.subr.mxu0 %v4916_v37  ;;  %4196 = vmatpush3.msra.mxu1 %v4910_v33 }
 0x58b   :  { %4239 = vmatpush3.msra.mxu0 %v4916_v37  ;;  %4197 = vmatprep.subr.mxu1 %v4926_v43 }
 0x58c   :  { %4240 = vmatprep.subr.mxu0 %v4998_v59  ;;  %4198 = vmatpush3.msra.mxu1 %v4926_v43 }
 0x58d   :  { %4241 = vmatpush3.msra.mxu0 %v4998_v59  ;;  %4199 = vmatprep.subr.mxu1 %v4940_v58 }
 0x58e   :  { %4242 = vmatprep.subr.mxu0 %v5003_v42  ;;  %4200 = vmatpush3.msra.mxu1 %v4940_v58 }
 0x58f   :  { %4243 = vmatpush3.msra.mxu0 %v5003_v42  ;;  %4201 = vmatprep.subr.mxu1 %v4954_v63 }
 0x590   :  { %4245 = vmatmul.mubr.f32.vlgmr.msra.gmra.mxu0 %v5046_v12  ;;  %4202 = vmatpush3.msra.mxu1 %v4954_v63 }
 0x591   :  { %4203 = vmatprep.subr.mxu1 %v4965_v6 }
 0x592   :  { %4204 = vmatpush3.msra.mxu1 %v4965_v6 }
 0x593   :  { %4205 = vmatprep.subr.mxu1 %v5008_v46 }
 0x594   :  { %4206 = vmatpush3.msra.mxu1 %v5008_v46 }
 0x595   :  { %4207 = vmatprep.subr.mxu1 %v5018_v53 }
 0x596   :  { %4208 = vmatpush3.msra.mxu1 %v5018_v53 }
 0x597   :  { %4210 = vmatmul.mubr.f32.vlgmr.msra.gmra.mxu1 %v5046_v12 }
 0x60d   :  { %v4106_v27 = vpop.f32.mrf.mxu0 }
 0x60f   :  { %v1165_v22 = vpop.f32.mrf.mxu0 }
 0x615   :  { %v4071_v13 = vpop.f32.mrf.mxu1 }
 0x616   :  { %v1172_v28 = vadd.f32 %v4106_v27, %v4071_v13  ;;  %v1636_v27 = vld [vmem:[#allocation2 + $0x148] sm:$0xff] }
 0x617   :  { %v1004_v11 = vpop.f32.mrf.mxu1  ;;  %4247 = vmatprep.subr.mxu1 %v1636_v27 }
 0x618   :  { %v1166_v17 = vadd.f32 %v1165_v22, %v1004_v11  ;;  %v1635_v11 = vld [vmem:[#allocation2 + $0x140] sm:$0xff]  ;;  %4248 = vmatpush3.msra.mxu1 %v1636_v27 }
 0x619   :  { %4249 = vmatprep.subr.mxu1 %v1635_v11 }
 0x61a   :  { %4250 = vmatpush3.msra.mxu1 %v1635_v11  ;;  %v5600_v11 = vld [vmem:[#allocation8_spill] sm:$0xff] }
 0x62e   :  { %v4176_v29 = vpop.f32.mrf.mxu0 }
 0x630   :  { %v1371_v40 = vpop.f32.mrf.mxu0 }
 0x636   :  { %v4141_v15 = vpop.f32.mrf.mxu1 }
 0x637   :  { %v1283_v47 = vadd.f32 %v4141_v15, %v1172_v28  ;;  %v1634_v15 = vld [vmem:[#allocation2 + $0x138] sm:$0xff] }
 0x638   :  { %v1275_v38 = vpop.f32.mrf.mxu1  ;;  %4251 = vmatprep.subr.mxu1 %v1634_v15 }
 0x639   :  { %v1276_v51 = vadd.f32 %v1275_v38, %v1166_v17  ;;  %v1380_v41 = vadd.f32 %v4176_v29, %v1283_v47  ;;  %4252 = vmatpush3.msra.mxu1 %v1634_v15  ;;  %v1630_v29 = vld [vmem:[#allocation2 + $0x118] sm:$0xff]  ;;  %v1629_v38 = vld [vmem:[#allocation2 + $0x110] sm:$0xff]  ;;  %v1740_v15 = vld [vmem:[#allocation2 + $0x188] sm:$0xff] }
 0x63a   :  { %4266 = vmatprep.subr.mxu0 %v1740_v15 }
 0x63b   :  { %v1372_v58 = vadd.f32 %v1371_v40, %v1276_v51  ;;  %4267 = vmatpush3.msra.mxu0 %v1740_v15  ;;  %v5601_v15 = vld [vmem:[#allocation5_spill] sm:$0xff] }
 0x650   :  { %v4246_v46 = vpop.f32.mrf.mxu0 }
 0x652   :  { %v1591_v33 = vpop.f32.mrf.mxu0 }
 0x657   :  { %v4211_v6 = vpop.f32.mrf.mxu1 }
 0x658   :  { %v1505_v63 = vadd.f32 %v4211_v6, %v1380_v41  ;;  %v1633_v6 = vld [vmem:[#allocation2 + $0x130] sm:$0xff] }
 0x659   :  { %v1498_v53 = vpop.f32.mrf.mxu1  ;;  %4253 = vmatprep.subr.mxu1 %v1633_v6 }
 0x65a   :  { %v1598_v43 = vadd.f32 %v4246_v46, %v1505_v63  ;;  %v1499_v12 = vadd.f32 %v1498_v53, %v1372_v58  ;;  %v1632_v63 = vld [vmem:[#allocation2 + $0x128] sm:$0xff]  ;;  %4254 = vmatpush3.msra.mxu1 %v1633_v6  ;;  %v1739_v6 = vld [vmem:[#allocation2 + $0x180] sm:$0xff] }
 0x65b   :  { %4255 = vmatprep.subr.mxu1 %v1632_v63  ;;  %4268 = vmatprep.subr.mxu0 %v1739_v6 }
 0x65c   :  { %v1592_v0 = vadd.f32 %v1591_v33, %v1499_v12  ;;  %v1602_v52 = vmul.f32 %v1598_v43, %v1598_v43  ;;  %v1631_v33 = vld [vmem:[#allocation2 + $0x120] sm:$0xff]  ;;  %4256 = vmatpush3.msra.mxu1 %v1632_v63  ;;  %v1614_v41 = vsub.f32 %v5034_v20, %v1598_v43  ;;  %4269 = vmatpush3.msra.mxu0 %v1739_v6  ;;  %v1738_v63 = vld [vmem:[#allocation2 + $0x178] sm:$0xff] }
 0x65d   :  { %4257 = vmatprep.subr.mxu1 %v1631_v33  ;;  %4270 = vmatprep.subr.mxu0 %v1738_v63  ;;  %v3613_v6 = vld [vmem:[#allocation2 + $0x198] ss:$0 sm:$0xff] }
 0x65e   :  { %1607 = vrot.lane.b32.xlu0 %v1602_v52, %s4672_s0  ;;  %v1601_v13 = vmul.f32 %v1592_v0, %v1592_v0  ;;  %4258 = vmatpush3.msra.mxu1 %v1631_v33  ;;  %v1613_v40 = vsub.f32 %v5036_v10, %v1592_v0  ;;  %v1735_v33 = vld [vmem:[#allocation2 + $0x160] sm:$0xff] }
 0x65f   :  { %4259 = vmatprep.subr.mxu1 %v1630_v29  ;;  %4271 = vmatpush3.msra.mxu0 %v1738_v63 }
 0x660   :  { %1605 = vrot.lane.b32.xlu1 %v1601_v13, %s4672_s0  ;;  %4260 = vmatpush3.msra.mxu1 %v1630_v29 }
 0x661   :  { %4261 = vmatprep.subr.mxu1 %v1629_v38 }
 0x662   :  { %4262 = vmatpush3.msra.mxu1 %v1629_v38 }
 0x6d0   :  { %v1608_v52 = vpop.permute.xlu0 %1607 }
 0x6d1   :  { %v1612_v58 = vsub.f32 %v1598_v43, %v1608_v52  ;;  %v1736_v43 = vld [vmem:[#allocation2 + $0x168] sm:$0xff]  ;;  %v1734_v52 = vld [vmem:[#allocation2 + $0x158] sm:$0xff] }
 0x6d2   :  { %v1606_v53 = vpop.permute.xlu1 %1605 }
 0x6d3   :  { %v1616_v46 = vadd.f32 1e-05, %v1612_v58  ;;  %v1611_v22 = vsub.f32 %v1592_v0, %v1606_v53  ;;  %v1737_v0 = vld [vmem:[#allocation2 + $0x170] sm:$0xff] }
 0x6d4   :  { %4272 = vmatprep.subr.mxu0 %v1737_v0  ;;  %v1733_v58 = vld [vmem:[#allocation2 + $0x150] sm:$0xff] }
 0x6d5   :  { %4623 = vrsqrt.f32 %v1616_v46  ;;  %v1615_v28 = vadd.f32 1e-05, %v1611_v22  ;;  %4273 = vmatpush3.msra.mxu0 %v1737_v0  ;;  %v3610_v53 = vld [vmem:[#allocation2 + $0x190] ss:$0 sm:$0xff] }
 0x6d6   :  { %4274 = vmatprep.subr.mxu0 %v1736_v43 }
 0x6d7   :  { %4625 = vrsqrt.f32 %v1615_v28  ;;  %4275 = vmatpush3.msra.mxu0 %v1736_v43 }
 0x6d8   :  { %4276 = vmatprep.subr.mxu0 %v1735_v33 }
 0x6d9   :  { %4277 = vmatpush3.msra.mxu0 %v1735_v33  ;;  %v5602_v33 = vld [vmem:[#allocation9_spill] sm:$0xff] }
 0x6da   :  { %4278 = vmatprep.subr.mxu0 %v1734_v52 }
 0x6db   :  { %4279 = vmatpush3.msra.mxu0 %v1734_v52 }
 0x6dc   :  { %4280 = vmatprep.subr.mxu0 %v1733_v58 }
 0x6dd   :  { %4281 = vmatpush3.msra.mxu0 %v1733_v58 }
 0x6e2   :  { %v4624_v17 = vpop.eup %4623 }
 0x6e3   :  { %1623 = vrot.lane.b32.xlu0 %v4624_v17, %s4672_s0 }
 0x6e4   :  { %v4626_v47 = vpop.eup %4625 }
 0x6e5   :  { %1621 = vrot.lane.b32.xlu1 %v4626_v47, %s4672_s0 }
 0x755   :  { %v1624_v51 = vpop.permute.xlu0 %1623 }
 0x756   :  { %v1628_v27 = vmul.f32 %v1624_v51, %v1614_v41 }
 0x757   :  { %v1622_v12 = vpop.permute.xlu1 %1621 }
 0x758   :  { %v1627_v13 = vmul.f32 %v1622_v12, %v1613_v40 }
 0x75a   :  { %4263 = vmatprep.mubr.msk.f32.mxu1 %vm163_vm2, %v1627_v13 }
 0x75b   :  { %4264 = vmatmul.mubr.msk.f32.vlgmr.msra.gmra.mxu1 %vm163_vm2, %v1628_v27 }
 0x75c   :  { %4289 = vmatprep.mubr.f32.mxu1 %v5600_v11 }
 0x81b   :  { %v4265_v46 = vpop.f32.mrf.mxu1 }
 0x81c   :  { %v1720_v22 = vadd.f32 %v4265_v46, %v3610_v53 }
 0x81d   :  { %v1714_v28 = vpop.f32.mrf.mxu1 }
 0x81e   :  { %v1726_v29 = vmul.f32 0.70710677, %v1720_v22  ;;  %v1715_v38 = vadd.f32 %v3610_v53, %v1714_v28  ;;  %v1724_v13 = vmul.f32 0.5, %v1720_v22  ;;  %v5603_v53 = vld [vmem:[#allocation10_spill] sm:$0xff] }
 0x820   :  { %4627 = verf.f32 %v1726_v29  ;;  %v1725_v17 = vmul.f32 0.70710677, %v1715_v38  ;;  %v1723_v41 = vmul.f32 0.5, %v1715_v38 }
 0x822   :  { %4629 = verf.f32 %v1725_v17 }
 0x82d   :  { %v4628_v47 = vpop.eup %4627 }
 0x82e   :  { %v1730_v40 = vadd.f32 1.0, %v4628_v47 }
 0x82f   :  { %v4630_v51 = vpop.eup %4629 }
 0x830   :  { %v1729_v12 = vadd.f32 1.0, %v4630_v51  ;;  %v1732_v11 = vmul.f32 %v1730_v40, %v1724_v13 }
 0x832   :  { %v1731_v27 = vmul.f32 %v1729_v12, %v1723_v41 }
 0x834   :  { %4282 = vmatprep.mubr.msk.f32.mxu0 %vm163_vm2, %v1731_v27  ;;  %v5604_v27 = vld [vmem:[#allocation14_spill] sm:$0xff] }
 0x835   :  { %4283 = vmatmul.mubr.msk.f32.vlgmr.msra.gmra.mxu0 %vm163_vm2, %v1732_v11 }
 0x836   :  { %4296 = vmatprep.mubr.f32.mxu0 %v5601_v15 }
 0x8f5   :  { %v4284_v63 = vpop.f32.mrf.mxu0 }
 0x8f6   :  { %v1824_v0 = vadd.f32 %v4284_v63, %v3613_v6  ;;  %v5605_v63 = vld [vmem:[#allocation6_spill] sm:$0xff] }
 0x8f7   :  { %v1818_v43 = vpop.f32.mrf.mxu0 }
 0x8f8   :  { %v5208_v52 = vadd.f32 %v1824_v0, %v5602_v33  ;;  %v1819_v58 = vadd.f32 %v3613_v6, %v1818_v43 }
 0x8fa   :  { %v5211_v46 = vadd.f32 %v1819_v58, %v5603_v53  ;;  %v1830_v22 = vmul.f32 %v5208_v52, %v5208_v52  ;;  %v5606_v58 = vld [vmem:[#allocation12_spill] sm:$0xff]  ;;  %v5607_v53 = vld [vmem:[#allocation11_spill] sm:$0xff] }
 0x8fc   :  { %1835 = vrot.lane.b32.xlu1 %v1830_v22, %s4672_s0  ;;  %v1829_v28 = vmul.f32 %v5211_v46, %v5211_v46  ;;  %v5608_v22 = vld [vmem:[#allocation7_spill] sm:$0xff] }
 0x8fe   :  { %1833 = vrot.lane.b32.xlu0 %v1829_v28, %s4672_s0  ;;  %v5609_v28 = vld [vmem:[#allocation13_spill] sm:$0xff] }
 0x96e   :  { %v1836_v29 = vpop.permute.xlu1 %1835 }
 0x96f   :  { %v1840_v38 = vsel %vm163_vm2, %v5208_v52, %v1836_v29 }
 0x970   :  { %v1870_v17 = vand.u32 4294901760, %v1840_v38  ;;  %v1834_v47 = vpop.permute.xlu0 %1833 }
 0x971   :  { %v1839_v51 = vsel %vm163_vm2, %v5211_v46, %v1834_v47 }
 0x972   :  { %v1958_v40 = vsub.f32 %v1840_v38, %v1870_v17  ;;  %v1873_v41 = vand.u32 4294901760, %v1839_v51  ;;  %4285 = vmatprep.subr.mxu1 %v1870_v17 }
 0x973   :  { %4286 = vmatpush3.msra.mxu1 %v1870_v17 }
 0x974   :  { %v1965_v12 = vsub.f32 %v1839_v51, %v1873_v41  ;;  %4287 = vmatprep.subr.mxu1 %v1873_v41  ;;  %v1959_v13 = vand.u32 4294901760, %v1958_v40 }
 0x975   :  { %4288 = vmatpush3.msra.mxu1 %v1873_v41 }
 0x976   :  { %4299 = vmatprep.subr.mxu1 %v1958_v40  ;;  %4290 = vmatmul.mubr.f32.vlgmr.msra.gmra.mxu1 %v5604_v27  ;;  %v1960_v11 = vsub.f32 %v1958_v40, %v1959_v13  ;;  %v1966_v6 = vand.u32 4294901760, %v1965_v12 }
 0x977   :  { %4300 = vmatpush3.msra.mxu1 %v1958_v40  ;;  %4303 = vmatprep.mubr.f32.mxu1 %v5605_v63 }
 0x978   :  { %4301 = vmatprep.subr.mxu1 %v1965_v12  ;;  %v1961_v0 = vand.u32 4294901760, %v1960_v11  ;;  %v1967_v43 = vsub.f32 %v1965_v12, %v1966_v6 }
 0x979   :  { %4302 = vmatpush3.msra.mxu1 %v1965_v12 }
 0x97a   :  { %4292 = vmatprep.subr.mxu0 %v1961_v0  ;;  %4313 = vmatprep.subr.mxu1 %v1959_v13  ;;  %v1968_v33 = vand.u32 4294901760, %v1967_v43 }
 0x97b   :  { %4293 = vmatpush3.msra.mxu0 %v1961_v0  ;;  %4304 = vmatmul.mubr.f32.vlgmr.msra.gmra.mxu1 %v5606_v58 }
 0x97c   :  { %4314 = vmatpush3.msra.mxu1 %v1959_v13  ;;  %4294 = vmatprep.subr.mxu0 %v1968_v33 }
 0x97d   :  { %4315 = vmatprep.subr.mxu1 %v1966_v6  ;;  %4295 = vmatpush3.msra.mxu0 %v1968_v33 }
 0x97e   :  { %4316 = vmatpush3.msra.mxu1 %v1966_v6  ;;  %4297 = vmatmul.mubr.f32.vlgmr.msra.gmra.mxu0 %v5607_v53 }
 0x97f   :  { %4306 = vmatprep.subr.mxu0 %v1870_v17  ;;  %4310 = vmatprep.mubr.f32.mxu0 %v5608_v22 }
 0x980   :  { %4307 = vmatpush3.msra.mxu0 %v1870_v17  ;;  %4317 = vmatprep.mubr.f32.mxu1 %v5601_v15 }
 0x981   :  { %4308 = vmatprep.subr.mxu0 %v1873_v41  ;;  %4318 = vmatmul.mubr.f32.vlgmr.msra.gmra.mxu1 %v5607_v53 }
 0x982   :  { %4309 = vmatpush3.msra.mxu0 %v1873_v41 }
 0x983   :  { %4311 = vmatmul.mubr.f32.vlgmr.msra.gmra.mxu0 %v5609_v28  ;;  %4320 = vmatprep.subr.mxu0 %v1870_v17 }
 0x984   :  { %4321 = vmatpush3.msra.mxu0 %v1870_v17  ;;  %4324 = vmatprep.mubr.f32.mxu0 %v5601_v15 }
 0x985   :  { %4322 = vmatprep.subr.mxu0 %v1873_v41 }
 0x986   :  { %4323 = vmatpush3.msra.mxu0 %v1873_v41 }
 0x987   :  { %4325 = vmatmul.mubr.f32.vlgmr.msra.gmra.mxu0 %v5607_v53 }
 0xa36   :  { %v4291_v29 = vpop.f32.mrf.mxu1 }
 0xa38   :  { %v1914_v38 = vpop.f32.mrf.mxu1 }
 0xa3b   :  { %v4305_v47 = vpop.f32.mrf.mxu1 }
 0xa3d   :  { %v2087_v12 = vpop.f32.mrf.mxu1 }
 0xa3e   :  { %v4298_v51 = vpop.f32.mrf.mxu0 }
 0xa3f   :  { %v2012_v40 = vadd.f32 %v4298_v51, %v4291_v29 }
 0xa40   :  { %v2005_v13 = vpop.f32.mrf.mxu0 }
 0xa41   :  { %v2095_v27 = vadd.f32 %v4305_v47, %v2012_v40  ;;  %v2006_v11 = vadd.f32 %v2005_v13, %v1914_v38  ;;  %v4319_v0 = vpop.f32.mrf.mxu1 }
 0xa43   :  { %v2088_v6 = vadd.f32 %v2087_v12, %v2006_v11  ;;  %v4312_v63 = vpop.f32.mrf.mxu0  ;;  %v2254_v58 = vpop.f32.mrf.mxu1 }
 0xa44   :  { %v2178_v43 = vadd.f32 %v4312_v63, %v2095_v27  ;;  %v2371_v27 = vld [vmem:[#allocation2 + $0x1a0] sm:$0xff]  ;;  %v2374_v63 = vld [vmem:[#allocation2 + $0x1c8] sm:$0xff] }
 0xa45   :  { %v2169_v17 = vpop.f32.mrf.mxu0  ;;  %4331 = vmatprep.mubr.msk.f32.mxu1 %vm166_vm1, %v2371_v27 }
 0xa46   :  { %v2261_v33 = vadd.f32 %v4319_v0, %v2178_v43  ;;  %v2170_v15 = vadd.f32 %v2169_v17, %v2088_v6  ;;  %v2478_v0 = vld [vmem:[#allocation2 + $0x1d0] sm:$0xff]  ;;  %v2479_v43 = vld [vmem:[#allocation2 + $0x1d8] sm:$0xff] }
 0xa47   :  { %v4326_v41 = vpop.f32.mrf.mxu0 }
 0xa48   :  { %v2255_v22 = vadd.f32 %v2254_v58, %v2170_v15  ;;  %v2340_v53 = vadd.f32 %v4326_v41, %v2261_v33 }
 0xa49   :  { %v2333_v28 = vpop.f32.mrf.mxu0 }
 0xa4a   :  { %v2334_v45 = vadd.f32 %v2333_v28, %v2255_v22  ;;  %v2344_v35 = vmul.f32 %v2340_v53, %v2340_v53  ;;  %v2356_v17 = vsub.f32 %v5208_v52, %v2340_v53  ;;  %v2372_v28 = vld [vmem:[#allocation2 + $0x1a8] sm:$0xff] }
 0xa4c   :  { %2349 = vrot.lane.b32.xlu1 %v2344_v35, %s4672_s0  ;;  %v2343_v29 = vmul.f32 %v2334_v45, %v2334_v45  ;;  %v2373_v35 = vld [vmem:[#allocation2 + $0x1c0] sm:$0xff]  ;;  %v2355_v58 = vsub.f32 %v5211_v46, %v2334_v45 }
 0xa4e   :  { %2347 = vrot.lane.b32.xlu0 %v2343_v29, %s4672_s0 }
 0xabe   :  { %v2350_v38 = vpop.permute.xlu1 %2349 }
 0xabf   :  { %v2354_v47 = vsub.f32 %v2340_v53, %v2350_v38 }
 0xac0   :  { %v2348_v51 = vpop.permute.xlu0 %2347 }
 0xac1   :  { %v2358_v40 = vadd.f32 1e-05, %v2354_v47  ;;  %v2353_v12 = vsub.f32 %v2334_v45, %v2348_v51  ;;  %v2476_v45 = vld [vmem:[#allocation2 + $0x1b0] sm:$0xff] }
 0xac2   :  { %4338 = vmatprep.mubr.msk.f32.mxu0 %vm166_vm1, %v2476_v45  ;;  %v5615_v45 = vld [vmem:[#allocation24_spill] sm:$0xff] }
 0xac3   :  { %4631 = vrsqrt.f32 %v2358_v40  ;;  %v2357_v13 = vadd.f32 1e-05, %v2353_v12 }
 0xac5   :  { %4633 = vrsqrt.f32 %v2357_v13 }
 0xad0   :  { %v4632_v11 = vpop.eup %4631 }
 0xad1   :  { %2365 = vrot.lane.b32.xlu1 %v4632_v11, %s4672_s0 }
 0xad2   :  { %v4634_v6 = vpop.eup %4633 }
 0xad3   :  { %2363 = vrot.lane.b32.xlu0 %v4634_v6, %s4672_s0 }
 0xad5   :  { %2382 = vperm.xlu1 %4614, %v2374_v63  }
 0xad7   :  { %2377 = vperm.xlu0 %4613, %v2373_v35  }
 0xad9   :  { %2482 = vperm.xlu1 %4614, %v2478_v0  }
 0xadb   :  { %2487 = vperm.xlu0 %4613, %v2479_v43  }
 0xb43   :  { %v2366_v33 = vpop.permute.xlu1 %2365 }
 0xb44   :  { %v2370_v15 = vmul.f32 %v2366_v33, %v2356_v17  ;;  %v2477_v33 = vld [vmem:[#allocation2 + $0x1b8] sm:$0xff] }
 0xb45   :  { %v2364_v41 = vpop.permute.xlu0 %2363 }
 0xb46   :  { %v2369_v22 = vmul.f32 %v2364_v41, %v2355_v58  ;;  %4327 = vmatprep.subr.mxu1 %v2370_v15  ;;  %v5611_v58 = vld [vmem:[#allocation17_spill] sm:$0xff]  ;;  %v5612_v41 = vld [vmem:[#allocation19_spill] sm:$0xff] }
 0xb47   :  { %4328 = vmatpush3.msra.mxu1 %v2370_v15  ;;  %v5610_v15 = vld [vmem:[#allocation16_spill] sm:$0xff] }
 0xb48   :  { %4329 = vmatprep.subr.mxu1 %v2369_v22 }
 0xb49   :  { %4330 = vmatpush3.msra.mxu1 %v2369_v22  ;;  %v5613_v22 = vld [vmem:[#allocation21_spill] sm:$0xff] }
 0xb4a   :  { %4332 = vmatmul.mubr.msk.f32.vlgmr.msra.gmra.mxu1 %vm166_vm1, %v2372_v28  ;;  %4341 = vmatprep.subr.mxu1 %v4774_v60  ;;  %v5614_v28 = vld [vmem:[#allocation22_spill] sm:$0xff] }
 0xb4b   :  { %4342 = vmatpush3.msra.mxu1 %v4774_v60 }
 0xb4c   :  { %4343 = vmatprep.subr.mxu1 %v4776_v61 }
 0xb4d   :  { %4344 = vmatpush3.msra.mxu1 %v4776_v61 }
 0xb4e   :  { %4345 = vmatprep.subr.mxu1 %v4778_v62 }
 0xb4f   :  { %4346 = vmatpush3.msra.mxu1 %v4778_v62 }
 0xb50   :  { %4347 = vmatprep.subr.mxu1 %v4780_v2  ;;  %v2383_v53 = vpop.permute.xlu1 %2382 }
 0xb51   :  { %4348 = vmatpush3.msra.mxu1 %v4780_v2 }
 0xb52   :  { %4349 = vmatprep.subr.mxu1 %v4782_v3  ;;  %v2378_v47 = vpop.permute.xlu0 %2377 }
 0xb53   :  { %4350 = vmatpush3.msra.mxu1 %v4782_v3 }
 0xb54   :  { %4351 = vmatprep.subr.mxu1 %v4784_v4 }
 0xb55   :  { %4352 = vmatpush3.msra.mxu1 %v4784_v4 }
 0xb56   :  { %4353 = vmatprep.subr.mxu1 %v4796_v14 }
 0xb57   :  { %4354 = vmatpush3.msra.mxu1 %v4796_v14 }
 0xb58   :  { %4355 = vmatprep.subr.mxu1 %v4808_v21 }
 0xb59   :  { %4356 = vmatpush3.msra.mxu1 %v4808_v21 }
 0xb5a   :  { %4357 = vmatprep.subr.mxu1 %v4861_v48 }
 0xb5b   :  { %4358 = vmatpush3.msra.mxu1 %v4861_v48 }
 0xb5c   :  { %4359 = vmatprep.subr.mxu1 %v4863_v49 }
 0xb5d   :  { %4360 = vmatpush3.msra.mxu1 %v4863_v49 }
 0xb5e   :  { %4361 = vmatprep.subr.mxu1 %v4865_v50 }
 0xb5f   :  { %4362 = vmatpush3.msra.mxu1 %v4865_v50 }
 0xb60   :  { %4363 = vmatprep.subr.mxu1 %v4884_v57 }
 0xb61   :  { %4364 = vmatpush3.msra.mxu1 %v4884_v57 }
 0xb62   :  { %4365 = vmatprep.subr.mxu1 %v4900_v5 }
 0xb63   :  { %4366 = vmatpush3.msra.mxu1 %v4900_v5 }
 0xb64   :  { %4367 = vmatprep.subr.mxu1 %v4916_v37 }
 0xb65   :  { %4368 = vmatpush3.msra.mxu1 %v4916_v37 }
 0xb66   :  { %4369 = vmatprep.subr.mxu1 %v4998_v59 }
 0xb67   :  { %4370 = vmatpush3.msra.mxu1 %v4998_v59 }
 0xb68   :  { %4371 = vmatprep.subr.mxu1 %v5003_v42 }
 0xb69   :  { %4372 = vmatpush3.msra.mxu1 %v5003_v42 }
 0xb6a   :  { %4411 = vmatprep.subr.mxu1 %v4787_v7 }
 0xc0a   :  { %v4333_v29 = vpop.f32.mrf.mxu1 }
 0xc0b   :  { %v2463_v38 = vadd.f32 %v4333_v29, %v2383_v53  ;;  %v5616_v53 = vld [vmem:[#allocation26_spill] sm:$0xff]  ;;  %v5617_v29 = vld [vmem:[#allocation28_spill] sm:$0xff] }
 0xc0c   :  { %v2457_v51 = vpop.f32.mrf.mxu1 }
 0xc0d   :  { %v2469_v40 = vmul.f32 0.70710677, %v2463_v38  ;;  %v2458_v12 = vadd.f32 %v2457_v51, %v2378_v47  ;;  %v2467_v11 = vmul.f32 0.5, %v2463_v38  ;;  %v5618_v38 = vld [vmem:[#allocation30_spill] sm:$0xff]  ;;  %v5619_v47 = vld [vmem:[#allocation32_spill] sm:$0xff] }
 0xc0e   :  { %v5620_v51 = vld [vmem:[#allocation34_spill] sm:$0xff] }
 0xc0f   :  { %4635 = verf.f32 %v2469_v40  ;;  %v2468_v13 = vmul.f32 0.70710677, %v2458_v12  ;;  %v2466_v35 = vmul.f32 0.5, %v2458_v12  ;;  %v5621_v40 = vld [vmem:[#allocation35_spill] sm:$0xff]  ;;  %v5622_v12 = vld [vmem:[#allocation36_spill] sm:$0xff] }
 0xc11   :  { %4637 = verf.f32 %v2468_v13  ;;  %v5623_v13 = vld [vmem:[#allocation37_spill] sm:$0xff] }
 0xc1c   :  { %v4636_v27 = vpop.eup %4635 }
 0xc1d   :  { %v2473_v6 = vadd.f32 1.0, %v4636_v27  ;;  %v5624_v27 = vld [vmem:[#allocation40_spill] sm:$0xff] }
 0xc1e   :  { %v4638_v63 = vpop.eup %4637 }
 0xc1f   :  { %v2475_v0 = vmul.f32 %v2473_v6, %v2467_v11  ;;  %v2472_v43 = vadd.f32 1.0, %v4638_v63  ;;  %v5625_v11 = vld [vmem:[#allocation41_spill] sm:$0xff]  ;;  %v2488_v6 = vpop.permute.xlu0 %2487 }
 0xc21   :  { %4334 = vmatprep.subr.mxu0 %v2475_v0  ;;  %v2474_v17 = vmul.f32 %v2472_v43, %v2466_v35 }
 0xc22   :  { %4335 = vmatpush3.msra.mxu0 %v2475_v0  ;;  %v2483_v0 = vpop.permute.xlu1 %2482 }
 0xc23   :  { %4336 = vmatprep.subr.mxu0 %v2474_v17 }
 0xc24   :  { %4337 = vmatpush3.msra.mxu0 %v2474_v17 }
 0xc25   :  { %4339 = vmatmul.mubr.msk.f32.vlgmr.msra.gmra.mxu0 %vm166_vm1, %v2477_v33  ;;  %4376 = vmatprep.subr.mxu0 %v5610_v15 }
 0xc26   :  { %4377 = vmatpush3.msra.mxu0 %v5610_v15 }
 0xc27   :  { %4378 = vmatprep.subr.mxu0 %v5611_v58 }
 0xc28   :  { %4379 = vmatpush3.msra.mxu0 %v5611_v58 }
 0xc29   :  { %4380 = vmatprep.subr.mxu0 %v5612_v41 }
 0xc2a   :  { %4381 = vmatpush3.msra.mxu0 %v5612_v41 }
 0xc2b   :  { %4382 = vmatprep.subr.mxu0 %v5613_v22 }
 0xc2c   :  { %4383 = vmatpush3.msra.mxu0 %v5613_v22 }
 0xc2d   :  { %4384 = vmatprep.subr.mxu0 %v5614_v28 }
 0xc2e   :  { %4385 = vmatpush3.msra.mxu0 %v5614_v28 }
 0xc2f   :  { %4386 = vmatprep.subr.mxu0 %v5615_v45 }
 0xc30   :  { %4387 = vmatpush3.msra.mxu0 %v5615_v45 }
 0xc31   :  { %4388 = vmatprep.subr.mxu0 %v5616_v53 }
 0xc32   :  { %4389 = vmatpush3.msra.mxu0 %v5616_v53 }
 0xc33   :  { %4390 = vmatprep.subr.mxu0 %v5617_v29 }
 0xc34   :  { %4391 = vmatpush3.msra.mxu0 %v5617_v29 }
 0xc35   :  { %4392 = vmatprep.subr.mxu0 %v5618_v38 }
 0xc36   :  { %4393 = vmatpush3.msra.mxu0 %v5618_v38 }
 0xc37   :  { %4394 = vmatprep.subr.mxu0 %v5619_v47 }
 0xc38   :  { %4395 = vmatpush3.msra.mxu0 %v5619_v47 }
 0xc39   :  { %4396 = vmatprep.subr.mxu0 %v5620_v51 }
 0xc3a   :  { %4397 = vmatpush3.msra.mxu0 %v5620_v51 }
 0xc3b   :  { %4398 = vmatprep.subr.mxu0 %v5621_v40 }
 0xc3c   :  { %4399 = vmatpush3.msra.mxu0 %v5621_v40 }
 0xc3d   :  { %4400 = vmatprep.subr.mxu0 %v5622_v12 }
 0xc3e   :  { %4401 = vmatpush3.msra.mxu0 %v5622_v12 }
 0xc3f   :  { %4402 = vmatprep.subr.mxu0 %v5623_v13 }
 0xc40   :  { %4403 = vmatpush3.msra.mxu0 %v5623_v13 }
 0xc41   :  { %4404 = vmatprep.subr.mxu0 %v5624_v27 }
 0xc42   :  { %4405 = vmatpush3.msra.mxu0 %v5624_v27 }
 0xc43   :  { %4406 = vmatprep.subr.mxu0 %v5625_v11 }
 0xc44   :  { %4407 = vmatpush3.msra.mxu0 %v5625_v11  ;;  %v3302_v11 = vld [vmem:[#allocation2 + $0x208] sm:$0xff] }
 0xc45   :  { %4446 = vmatprep.subr.mxu0 %v4774_v60 }
 0xce5   :  { %v4340_v63 = vpop.f32.mrf.mxu0 }
 0xce6   :  { %v2568_v35 = vadd.f32 %v4340_v63, %v2488_v6  ;;  %v3301_v6 = vld [vmem:[#allocation2 + $0x200] sm:$0xff]  ;;  %v3300_v63 = vld [vmem:[#allocation2 + $0x1f8] sm:$0xff] }
 0xce7   :  { %v2562_v43 = vpop.f32.mrf.mxu0 }
 0xce8   :  { %v5310_v17 = vadd.f32 %v2568_v35, %v5034_v20  ;;  %v2563_v33 = vadd.f32 %v2562_v43, %v2483_v0  ;;  %v3299_v35 = vld [vmem:[#allocation2 + $0x1f0] sm:$0xff] }
 0xcea   :  { %v5313_v15 = vadd.f32 %v2563_v33, %v5036_v10  ;;  %v2574_v58 = vmul.f32 %v5310_v17, %v5310_v17 }
 0xcec   :  { %2579 = vrot.lane.b32.xlu0 %v2574_v58, %s4672_s0  ;;  %v2573_v41 = vmul.f32 %v5313_v15, %v5313_v15 }
 0xcee   :  { %2577 = vrot.lane.b32.xlu1 %v2573_v41, %s4672_s0 }
 0xd5e   :  { %v2580_v22 = vpop.permute.xlu0 %2579 }
 0xd5f   :  { %v2584_v28 = vsel %vm163_vm2, %v5310_v17, %v2580_v22 }
 0xd60   :  { %v5323_v20 = vand.u32 4294901760, %v2584_v28  ;;  %v2578_v45 = vpop.permute.xlu1 %2577 }
 0xd61   :  { %v2583_v10 = vsel %vm163_vm2, %v5313_v15, %v2578_v45 }
 0xd62   :  { %v5328_v53 = vsub.f32 %v2584_v28, %v5323_v20  ;;  %v5330_v29 = vand.u32 4294901760, %v2583_v10  ;;  %v3298_v28 = vld [vmem:[#allocation2 + $0x1e8] sm:$0xff] }
 0xd64   :  { %v2678_v38 = vand.u32 4294901760, %v5328_v53  ;;  %v2667_v47 = vsub.f32 %v2583_v10, %v5330_v29  ;;  %4408 = vmatprep.mubr.f32.mxu0 %v5330_v29 }
 0xd65   :  { %4409 = vmatmul.mubr.f32.vlgmr.msra.gmra.mxu0 %v5323_v20 }
 0xd66   :  { %4447 = vmatpush3.msra.mxu0 %v4774_v60  ;;  %v2668_v51 = vand.u32 4294901760, %v2667_v47  ;;  %v2679_v40 = vsub.f32 %v5328_v53, %v2678_v38 }
 0xd67   :  { %4448 = vmatprep.subr.mxu0 %v4776_v61 }
 0xd68   :  { %4449 = vmatpush3.msra.mxu0 %v4776_v61  ;;  %4478 = vmatprep.mubr.f32.mxu0 %v2668_v51  ;;  %v2669_v12 = vsub.f32 %v2667_v47, %v2668_v51  ;;  %v2680_v27 = vand.u32 4294901760, %v2679_v40 }
 0xd69   :  { %4450 = vmatprep.subr.mxu0 %v4778_v62 }
 0xd6a   :  { %4451 = vmatpush3.msra.mxu0 %v4778_v62  ;;  %v2670_v13 = vand.u32 4294901760, %v2669_v12  ;;  %v3408_v12 = vld [vmem:[#allocation2 + $0x258] sm:$0xff] }
 0xd6b   :  { %4452 = vmatprep.subr.mxu0 %v4780_v2 }
 0xd6c   :  { %4453 = vmatpush3.msra.mxu0 %v4780_v2  ;;  %4373 = vmatprep.mubr.f32.mxu1 %v2670_v13  ;;  %v3407_v13 = vld [vmem:[#allocation2 + $0x250] sm:$0xff] }
 0xd6d   :  { %4454 = vmatprep.subr.mxu0 %v4782_v3  ;;  %4374 = vmatmul.mubr.f32.vlgmr.msra.gmra.mxu1 %v2680_v27  ;;  %v3406_v27 = vld [vmem:[#allocation2 + $0x248] sm:$0xff] }
 0xd6e   :  { %4412 = vmatpush3.msra.mxu1 %v4787_v7  ;;  %4455 = vmatpush3.msra.mxu0 %v4782_v3  ;;  %v5632_v7 = vld [vmem:[#allocation29_spill] sm:$0xff] }
 0xd6f   :  { %4413 = vmatprep.subr.mxu1 %v4790_v8  ;;  %4443 = vmatprep.mubr.f32.mxu1 %v2667_v47 }
 0xd70   :  { %4456 = vmatprep.subr.mxu0 %v4784_v4  ;;  %4414 = vmatpush3.msra.mxu1 %v4790_v8  ;;  %v5633_v8 = vld [vmem:[#allocation31_spill] sm:$0xff] }
 0xd71   :  { %4457 = vmatpush3.msra.mxu0 %v4784_v4  ;;  %4415 = vmatprep.subr.mxu1 %v4793_v9 }
 0xd72   :  { %4458 = vmatprep.subr.mxu0 %v4796_v14  ;;  %4416 = vmatpush3.msra.mxu1 %v4793_v9  ;;  %v5634_v9 = vld [vmem:[#allocation33_spill] sm:$0xff] }
 0xd73   :  { %4459 = vmatpush3.msra.mxu0 %v4796_v14  ;;  %4417 = vmatprep.subr.mxu1 %v4799_v16 }
 0xd74   :  { %4460 = vmatprep.subr.mxu0 %v4808_v21  ;;  %4418 = vmatpush3.msra.mxu1 %v4799_v16  ;;  %v5636_v16 = vld [vmem:[#allocation39_spill] sm:$0xff] }
 0xd75   :  { %4461 = vmatpush3.msra.mxu0 %v4808_v21  ;;  %4419 = vmatprep.subr.mxu1 %v4802_v18 }
 0xd76   :  { %4462 = vmatprep.subr.mxu0 %v4861_v48  ;;  %4420 = vmatpush3.msra.mxu1 %v4802_v18 }
 0xd77   :  { %4463 = vmatpush3.msra.mxu0 %v4861_v48  ;;  %4421 = vmatprep.subr.mxu1 %v4806_v19 }
 0xd78   :  { %4464 = vmatprep.subr.mxu0 %v4863_v49  ;;  %4422 = vmatpush3.msra.mxu1 %v4806_v19 }
 0xd79   :  { %4465 = vmatpush3.msra.mxu0 %v4863_v49  ;;  %4423 = vmatprep.subr.mxu1 %v4828_v31 }
 0xd7a   :  { %4466 = vmatprep.subr.mxu0 %v4865_v50  ;;  %4424 = vmatpush3.msra.mxu1 %v4828_v31 }
 0xd7b   :  { %4467 = vmatpush3.msra.mxu0 %v4865_v50  ;;  %4425 = vmatprep.subr.mxu1 %v4842_v36 }
 0xd7c   :  { %4468 = vmatprep.subr.mxu0 %v4884_v57  ;;  %4426 = vmatpush3.msra.mxu1 %v4842_v36 }
 0xd7d   :  { %4469 = vmatpush3.msra.mxu0 %v4884_v57  ;;  %4427 = vmatprep.subr.mxu1 %v4878_v55 }
 0xd7e   :  { %4470 = vmatprep.subr.mxu0 %v4900_v5  ;;  %4428 = vmatpush3.msra.mxu1 %v4878_v55 }
 0xd7f   :  { %4471 = vmatpush3.msra.mxu0 %v4900_v5  ;;  %4429 = vmatprep.subr.mxu1 %v4882_v56 }
 0xd80   :  { %4472 = vmatprep.subr.mxu0 %v4916_v37  ;;  %4430 = vmatpush3.msra.mxu1 %v4882_v56 }
 0xd81   :  { %4473 = vmatpush3.msra.mxu0 %v4916_v37  ;;  %4431 = vmatprep.subr.mxu1 %v4898_v1 }
 0xd82   :  { %4474 = vmatprep.subr.mxu0 %v4998_v59  ;;  %4432 = vmatpush3.msra.mxu1 %v4898_v1 }
 0xd83   :  { %4475 = vmatpush3.msra.mxu0 %v4998_v59  ;;  %4433 = vmatprep.subr.mxu1 %v4914_v34 }
 0xd84   :  { %4476 = vmatprep.subr.mxu0 %v5003_v42  ;;  %4434 = vmatpush3.msra.mxu1 %v4914_v34 }
 0xd85   :  { %4477 = vmatpush3.msra.mxu0 %v5003_v42  ;;  %4435 = vmatprep.subr.mxu1 %v4930_v44 }
 0xd86   :  { %4479 = vmatmul.mubr.f32.vlgmr.msra.gmra.mxu0 %v2678_v38  ;;  %4516 = vmatprep.subr.mxu0 %v4774_v60 }
 0xd87   :  { %4436 = vmatpush3.msra.mxu1 %v4930_v44  ;;  %4517 = vmatpush3.msra.mxu0 %v4774_v60  ;;  %v5626_v60 = vld [vmem:[#allocation15_spill] sm:$0xff] }
 0xd88   :  { %4548 = vmatprep.mubr.f32.mxu0 %v5330_v29  ;;  %4437 = vmatprep.subr.mxu1 %v4944_v54 }
 0xd89   :  { %4518 = vmatprep.subr.mxu0 %v4776_v61  ;;  %4438 = vmatpush3.msra.mxu1 %v4944_v54 }
 0xd8a   :  { %4519 = vmatpush3.msra.mxu0 %v4776_v61  ;;  %4439 = vmatprep.subr.mxu1 %v5001_v39  ;;  %v5627_v61 = vld [vmem:[#allocation18_spill] sm:$0xff] }
 0xd8b   :  { %4520 = vmatprep.subr.mxu0 %v4778_v62  ;;  %4440 = vmatpush3.msra.mxu1 %v5001_v39 }
 0xd8c   :  { %4521 = vmatpush3.msra.mxu0 %v4778_v62  ;;  %4441 = vmatprep.subr.mxu1 %v5011_v32  ;;  %v5628_v62 = vld [vmem:[#allocation20_spill] sm:$0xff] }
 0xd8d   :  { %4522 = vmatprep.subr.mxu0 %v4780_v2  ;;  %4442 = vmatpush3.msra.mxu1 %v5011_v32  ;;  %v3303_v32 = vld [vmem:[#allocation2 + $0x210] sm:$0xff] }
 0xd8e   :  { %4523 = vmatpush3.msra.mxu0 %v4780_v2  ;;  %4444 = vmatmul.mubr.f32.vlgmr.msra.gmra.mxu1 %v5328_v53  ;;  %v5629_v2 = vld [vmem:[#allocation23_spill] sm:$0xff] }
 0xd8f   :  { %4481 = vmatprep.subr.mxu1 %v4811_v23  ;;  %4524 = vmatprep.subr.mxu0 %v4782_v3 }
 0xd90   :  { %4482 = vmatpush3.msra.mxu1 %v4811_v23  ;;  %4513 = vmatprep.mubr.f32.mxu1 %v5330_v29 }
 0xd91   :  { %4525 = vmatpush3.msra.mxu0 %v4782_v3  ;;  %4483 = vmatprep.subr.mxu1 %v4814_v24  ;;  %v5630_v3 = vld [vmem:[#allocation25_spill] sm:$0xff] }
 0xd92   :  { %4526 = vmatprep.subr.mxu0 %v4784_v4  ;;  %4484 = vmatpush3.msra.mxu1 %v4814_v24 }
 0xd93   :  { %4527 = vmatpush3.msra.mxu0 %v4784_v4  ;;  %4485 = vmatprep.subr.mxu1 %v4817_v25  ;;  %v5631_v4 = vld [vmem:[#allocation27_spill] sm:$0xff] }
 0xd94   :  { %4528 = vmatprep.subr.mxu0 %v4796_v14  ;;  %4486 = vmatpush3.msra.mxu1 %v4817_v25 }
 0xd95   :  { %4529 = vmatpush3.msra.mxu0 %v4796_v14  ;;  %4487 = vmatprep.subr.mxu1 %v4821_v26  ;;  %v5635_v14 = vld [vmem:[#allocation38_spill] sm:$0xff] }
 0xd96   :  { %4530 = vmatprep.subr.mxu0 %v4808_v21  ;;  %4488 = vmatpush3.msra.mxu1 %v4821_v26 }
 0xd97   :  { %4531 = vmatpush3.msra.mxu0 %v4808_v21  ;;  %4489 = vmatprep.subr.mxu1 %v4824_v30 }
 0xd98   :  { %4532 = vmatprep.subr.mxu0 %v4861_v48  ;;  %4490 = vmatpush3.msra.mxu1 %v4824_v30 }
 0xd99   :  { %4533 = vmatpush3.msra.mxu0 %v4861_v48  ;;  %4491 = vmatprep.subr.mxu1 %v5626_v60 }
 0xd9a   :  { %4534 = vmatprep.subr.mxu0 %v4863_v49  ;;  %4492 = vmatpush3.msra.mxu1 %v5626_v60  ;;  %v3405_v60 = vld [vmem:[#allocation2 + $0x240] sm:$0xff] }
 0xd9b   :  { %4535 = vmatpush3.msra.mxu0 %v4863_v49  ;;  %4493 = vmatprep.subr.mxu1 %v5627_v61 }
 0xd9c   :  { %4536 = vmatprep.subr.mxu0 %v4865_v50  ;;  %4494 = vmatpush3.msra.mxu1 %v5627_v61  ;;  %v3404_v61 = vld [vmem:[#allocation2 + $0x238] sm:$0xff] }
 0xd9d   :  { %4537 = vmatpush3.msra.mxu0 %v4865_v50  ;;  %4495 = vmatprep.subr.mxu1 %v5628_v62 }
 0xd9e   :  { %4538 = vmatprep.subr.mxu0 %v4884_v57  ;;  %4496 = vmatpush3.msra.mxu1 %v5628_v62  ;;  %v3403_v62 = vld [vmem:[#allocation2 + $0x230] sm:$0xff] }
 0xd9f   :  { %4539 = vmatpush3.msra.mxu0 %v4884_v57  ;;  %4497 = vmatprep.subr.mxu1 %v5629_v2 }
 0xda0   :  { %4540 = vmatprep.subr.mxu0 %v4900_v5  ;;  %4498 = vmatpush3.msra.mxu1 %v5629_v2  ;;  %v3402_v2 = vld [vmem:[#allocation2 + $0x228] sm:$0xff] }
 0xda1   :  { %4541 = vmatpush3.msra.mxu0 %v4900_v5  ;;  %4499 = vmatprep.subr.mxu1 %v5630_v3 }
 0xda2   :  { %4542 = vmatprep.subr.mxu0 %v4916_v37  ;;  %4500 = vmatpush3.msra.mxu1 %v5630_v3  ;;  %v3401_v3 = vld [vmem:[#allocation2 + $0x220] sm:$0xff] }
 0xda3   :  { %4543 = vmatpush3.msra.mxu0 %v4916_v37  ;;  %4501 = vmatprep.subr.mxu1 %v5631_v4 }
 0xda4   :  { %4544 = vmatprep.subr.mxu0 %v4998_v59  ;;  %4502 = vmatpush3.msra.mxu1 %v5631_v4  ;;  %v3508_v4 = vld [vmem:[#allocation2 + $0x2a8] sm:$0xff] }
 0xda5   :  { %4545 = vmatpush3.msra.mxu0 %v4998_v59  ;;  %4503 = vmatprep.subr.mxu1 %v5632_v7  ;;  %v3304_v59 = vld [vmem:[#allocation2 + $0x218] sm:$0xff] }
 0xda6   :  { %4546 = vmatprep.subr.mxu0 %v5003_v42  ;;  %4504 = vmatpush3.msra.mxu1 %v5632_v7  ;;  %v3507_v7 = vld [vmem:[#allocation2 + $0x2a0] sm:$0xff] }
 0xda7   :  { %4547 = vmatpush3.msra.mxu0 %v5003_v42  ;;  %4505 = vmatprep.subr.mxu1 %v5633_v8 }
 0xda8   :  { %4549 = vmatmul.mubr.f32.vlgmr.msra.gmra.mxu0 %v5323_v20  ;;  %4506 = vmatpush3.msra.mxu1 %v5633_v8  ;;  %v3620_v8 = vld [vmem:[#allocation2 + $0x260] ss:$0 sm:$0xff] }
 0xda9   :  { %4507 = vmatprep.subr.mxu1 %v5634_v9  ;;  %4570 = vmatprep.subr.mxu0 %v3408_v12 }
 0xdaa   :  { %4508 = vmatpush3.msra.mxu1 %v5634_v9  ;;  %4571 = vmatpush3.msra.mxu0 %v3408_v12 }
 0xdab   :  { %4509 = vmatprep.subr.mxu1 %v5635_v14  ;;  %4572 = vmatprep.subr.mxu0 %v3407_v13 }
 0xdac   :  { %4510 = vmatpush3.msra.mxu1 %v5635_v14  ;;  %4573 = vmatpush3.msra.mxu0 %v3407_v13 }
 0xdad   :  { %4511 = vmatprep.subr.mxu1 %v5636_v16  ;;  %4574 = vmatprep.subr.mxu0 %v3406_v27 }
 0xdae   :  { %4512 = vmatpush3.msra.mxu1 %v5636_v16  ;;  %4575 = vmatpush3.msra.mxu0 %v3406_v27 }
 0xdaf   :  { %4514 = vmatmul.mubr.f32.vlgmr.msra.gmra.mxu1 %v5323_v20  ;;  %4551 = vmatprep.subr.mxu1 %v3304_v59  ;;  %v3297_v20 = vld [vmem:[#allocation2 + $0x1e0] sm:$0xff] }
 0xdb0   :  { %4552 = vmatpush3.msra.mxu1 %v3304_v59  ;;  %4576 = vmatprep.subr.mxu0 %v3405_v60 }
 0xdb1   :  { %4553 = vmatprep.subr.mxu1 %v3303_v32  ;;  %4577 = vmatpush3.msra.mxu0 %v3405_v60 }
 0xdb2   :  { %4554 = vmatpush3.msra.mxu1 %v3303_v32  ;;  %4578 = vmatprep.subr.mxu0 %v3404_v61 }
 0xdb3   :  { %4555 = vmatprep.subr.mxu1 %v3302_v11  ;;  %4579 = vmatpush3.msra.mxu0 %v3404_v61 }
 0xdb4   :  { %4556 = vmatpush3.msra.mxu1 %v3302_v11  ;;  %4580 = vmatprep.subr.mxu0 %v3403_v62 }
 0xdb5   :  { %4557 = vmatprep.subr.mxu1 %v3301_v6  ;;  %4581 = vmatpush3.msra.mxu0 %v3403_v62 }
 0xdb6   :  { %4558 = vmatpush3.msra.mxu1 %v3301_v6  ;;  %4582 = vmatprep.subr.mxu0 %v3402_v2 }
 0xdb7   :  { %4559 = vmatprep.subr.mxu1 %v3300_v63  ;;  %4583 = vmatpush3.msra.mxu0 %v3402_v2 }
 0xdb8   :  { %4560 = vmatpush3.msra.mxu1 %v3300_v63  ;;  %4584 = vmatprep.subr.mxu0 %v3401_v3  ;;  %v3626_v63 = vld [vmem:[#allocation2 + $0x2b0] ss:$0 sm:$0xff] }
 0xdb9   :  { %4561 = vmatprep.subr.mxu1 %v3299_v35  ;;  %4585 = vmatpush3.msra.mxu0 %v3401_v3 }
 0xdba   :  { %4562 = vmatpush3.msra.mxu1 %v3299_v35 }
 0xdbb   :  { %4563 = vmatprep.subr.mxu1 %v3298_v28 }
 0xdbc   :  { %4564 = vmatpush3.msra.mxu1 %v3298_v28 }
 0xdbd   :  { %4565 = vmatprep.subr.mxu1 %v3297_v20 }
 0xdbe   :  { %4566 = vmatpush3.msra.mxu1 %v3297_v20 }
 0xdbf   :  { %4589 = vmatprep.subr.mxu1 %v3508_v4 }
 0xe25   :  { %v4410_v19 = vpop.f32.mrf.mxu0 }
 0xe27   :  { %v2833_v24 = vpop.f32.mrf.mxu0 }
 0xe2d   :  { %v4375_v18 = vpop.f32.mrf.mxu1 }
 0xe2e   :  { %v2840_v25 = vadd.f32 %v4410_v19, %v4375_v18 }
 0xe2f   :  { %v2672_v21 = vpop.f32.mrf.mxu1 }
 0xe30   :  { %v2834_v31 = vadd.f32 %v2833_v24, %v2672_v21 }
 0xe46   :  { %v4480_v26 = vpop.f32.mrf.mxu0 }
 0xe48   :  { %v3039_v48 = vpop.f32.mrf.mxu0 }
 0xe4e   :  { %v4445_v23 = vpop.f32.mrf.mxu1 }
 0xe4f   :  { %v2951_v36 = vadd.f32 %v4445_v23, %v2840_v25 }
 0xe50   :  { %v2943_v30 = vpop.f32.mrf.mxu1 }
 0xe51   :  { %v2944_v42 = vadd.f32 %v2943_v30, %v2834_v31  ;;  %v3048_v49 = vadd.f32 %v4480_v26, %v2951_v36 }
 0xe53   :  { %v3040_v56 = vadd.f32 %v3039_v48, %v2944_v42  ;;  %v3506_v48 = vld [vmem:[#allocation2 + $0x298] sm:$0xff] }
 0xe68   :  { %v4550_v50 = vpop.f32.mrf.mxu0 }
 0xe6a   :  { %v3259_v34 = vpop.f32.mrf.mxu0 }
 0xe6f   :  { %v4515_v54 = vpop.f32.mrf.mxu1 }
 0xe70   :  { %v3173_v55 = vadd.f32 %v4515_v54, %v3048_v49  ;;  %v3505_v49 = vld [vmem:[#allocation2 + $0x290] sm:$0xff]  ;;  %v3503_v54 = vld [vmem:[#allocation2 + $0x280] sm:$0xff] }
 0xe71   :  { %v3166_v57 = vpop.f32.mrf.mxu1 }
 0xe72   :  { %v3266_v1 = vadd.f32 %v4550_v50, %v3173_v55  ;;  %v3167_v5 = vadd.f32 %v3166_v57, %v3040_v56  ;;  %v3504_v50 = vld [vmem:[#allocation2 + $0x288] sm:$0xff]  ;;  %v3502_v55 = vld [vmem:[#allocation2 + $0x278] sm:$0xff]  ;;  %v3501_v56 = vld [vmem:[#allocation2 + $0x270] sm:$0xff] }
 0xe73   :  { %v3623_v57 = vld [vmem:[#allocation2 + $0x268] ss:$0 sm:$0xff] }
 0xe74   :  { %v3260_v37 = vadd.f32 %v3259_v34, %v3167_v5  ;;  %v3270_v39 = vmul.f32 %v3266_v1, %v3266_v1  ;;  %v3282_v38 = vsub.f32 %v5310_v17, %v3266_v1 }
 0xe76   :  { %3275 = vrot.lane.b32.xlu0 %v3270_v39, %s4672_s0  ;;  %v3269_v44 = vmul.f32 %v3260_v37, %v3260_v37  ;;  %v3281_v29 = vsub.f32 %v5313_v15, %v3260_v37 }
 0xe78   :  { %3273 = vrot.lane.b32.xlu1 %v3269_v44, %s4672_s0 }
 0xee8   :  { %v3276_v0 = vpop.permute.xlu0 %3275 }
 0xee9   :  { %v3280_v43 = vsub.f32 %v3266_v1, %v3276_v0 }
 0xeea   :  { %v3274_v33 = vpop.permute.xlu1 %3273 }
 0xeeb   :  { %v3284_v58 = vadd.f32 1e-05, %v3280_v43  ;;  %v3279_v41 = vsub.f32 %v3260_v37, %v3274_v33 }
 0xeed   :  { %4639 = vrsqrt.f32 %v3284_v58  ;;  %v3283_v22 = vadd.f32 1e-05, %v3279_v41 }
 0xeef   :  { %4641 = vrsqrt.f32 %v3283_v22 }
 0xefa   :  { %v4640_v45 = vpop.eup %4639 }
 0xefb   :  { %3291 = vrot.lane.b32.xlu0 %v4640_v45, %s4672_s0 }
 0xefc   :  { %v4642_v10 = vpop.eup %4641 }
 0xefd   :  { %3289 = vrot.lane.b32.xlu1 %v4642_v10, %s4672_s0 }
 0xf6d   :  { %v3292_v53 = vpop.permute.xlu0 %3291 }
 0xf6e   :  { %v3296_v40 = vmul.f32 %v3292_v53, %v3282_v38 }
 0xf6f   :  { %v3290_v47 = vpop.permute.xlu1 %3289 }
 0xf70   :  { %v3295_v51 = vmul.f32 %v3290_v47, %v3281_v29 }
 0xf72   :  { %4567 = vmatprep.mubr.msk.f32.mxu1 %vm163_vm2, %v3295_v51 }
 0xf73   :  { %4568 = vmatmul.mubr.msk.f32.vlgmr.msra.gmra.mxu1 %vm163_vm2, %v3296_v40 }
 0xf74   :  { %4590 = vmatpush3.msra.mxu1 %v3508_v4 }
 0xf75   :  { %4591 = vmatprep.subr.mxu1 %v3507_v7 }
 0xf76   :  { %4592 = vmatpush3.msra.mxu1 %v3507_v7 }
 0xf77   :  { %4593 = vmatprep.subr.mxu1 %v3506_v48 }
 0xf78   :  { %4594 = vmatpush3.msra.mxu1 %v3506_v48 }
 0xf79   :  { %4595 = vmatprep.subr.mxu1 %v3505_v49 }
 0xf7a   :  { %4596 = vmatpush3.msra.mxu1 %v3505_v49 }
 0xf7b   :  { %4597 = vmatprep.subr.mxu1 %v3504_v50 }
 0xf7c   :  { %4598 = vmatpush3.msra.mxu1 %v3504_v50 }
 0xf7d   :  { %4599 = vmatprep.subr.mxu1 %v3503_v54 }
 0xf7e   :  { %4600 = vmatpush3.msra.mxu1 %v3503_v54 }
 0xf7f   :  { %4601 = vmatprep.subr.mxu1 %v3502_v55 }
 0xf80   :  { %4602 = vmatpush3.msra.mxu1 %v3502_v55 }
 0xf81   :  { %4603 = vmatprep.subr.mxu1 %v3501_v56 }
 0xf82   :  { %4604 = vmatpush3.msra.mxu1 %v3501_v56 }
0x1033   :  { %v4569_v9 = vpop.f32.mrf.mxu1 }
0x1034   :  { %v3388_v14 = vadd.f32 %v4569_v9, %v3620_v8 }
0x1035   :  { %v3382_v16 = vpop.f32.mrf.mxu1 }
0x1036   :  { %v3394_v18 = vmul.f32 0.70710677, %v3388_v14  ;;  %v3383_v19 = vadd.f32 %v3620_v8, %v3382_v16  ;;  %v3392_v31 = vmul.f32 0.5, %v3388_v14 }
0x1038   :  { %4643 = verf.f32 %v3394_v18  ;;  %v3393_v21 = vmul.f32 0.70710677, %v3383_v19  ;;  %v3391_v26 = vmul.f32 0.5, %v3383_v19 }
0x103a   :  { %4645 = verf.f32 %v3393_v21 }
0x1045   :  { %v4644_v23 = vpop.eup %4643 }
0x1046   :  { %v3398_v25 = vadd.f32 1.0, %v4644_v23 }
0x1047   :  { %v4646_v24 = vpop.eup %4645 }
0x1048   :  { %v3397_v30 = vadd.f32 1.0, %v4646_v24  ;;  %v3400_v42 = vmul.f32 %v3398_v25, %v3392_v31 }
0x104a   :  { %v3399_v36 = vmul.f32 %v3397_v30, %v3391_v26 }
0x104c   :  { %4586 = vmatprep.mubr.msk.f32.mxu0 %vm163_vm2, %v3399_v36 }
0x104d   :  { %4587 = vmatmul.mubr.msk.f32.vlgmr.msra.gmra.mxu0 %vm163_vm2, %v3400_v42 }
0x110d   :  { %v4588_v1 = vpop.f32.mrf.mxu0 }
0x110e   :  { %v3492_v5 = vadd.f32 %v4588_v1, %v3623_v57 }
0x110f   :  { %v3486_v34 = vpop.f32.mrf.mxu0 }
0x1110   :  { %v3496_v37 = vadd.f32 %v3492_v5, %v5208_v52  ;;  %v3487_v39 = vadd.f32 %v3623_v57, %v3486_v34 }
0x1112   :  { %v3495_v44 = vadd.f32 %v3487_v39, %v5211_v46  ;;  %v3498_v59 = vadd.f32 %v3496_v37, %v5310_v17 }
0x1114   :  { %v3497_v32 = vadd.f32 %v3495_v44, %v5313_v15  ;;  %v3500_v6 = vmul.f32 0.5, %v3498_v59 }
0x1116   :  { %v3499_v11 = vmul.f32 0.5, %v3497_v32 }
0x1118   :  { %4605 = vmatprep.mubr.msk.f32.mxu1 %vm163_vm2, %v3499_v11 }
0x1119   :  { %4606 = vmatmul.mubr.msk.f32.vlgmr.msra.gmra.mxu1 %vm163_vm2, %v3500_v6 }
0x11d9   :  { %v4607_v35 = vpop.f32.mrf.mxu1 }
0x11da   :  { %v3592_v0 = vadd.f32 %v4607_v35, %v3626_v63 }
0x11db   :  { %v3586_v43 = vpop.f32.mrf.mxu1 }
0x11dc   :  { %3596 = vst [vmem:[%s5496_s2 + $0x8] sm:$0xff] %v3592_v0  ;;  %v3587_v52 = vadd.f32 %v3626_v63, %v3586_v43 }
0x11de   :  { %3595 = vst [vmem:[%s5496_s2] sm:$0xff] %v3587_v52 }
0x11df   :  { %3601 = vsyncpa [#allocation3], 1 }

</bundles_post_ra>
